<compile_context>
chip_gen: v6e
topology: v6e:2x2x1
jax: 0.10.0
libtpu: 0.0.40
codegen_flags: <defaults>
</compile_context>

<pallas_src>
import jax
import jax.numpy as jnp
from jax.experimental import pallas as pl
from jax.experimental.pallas import tpu as pltpu

EPS = 1e-5          # nn.BatchNorm1d default eps
NEG_SLOPE = 0.01    # nn.LeakyReLU default negative_slope


def _make_discriminator_kernel(num_bn, bn_widths, out_dim, last_hidden,
                               groups, group_batch, fuse_last):
    """Fused forward kernel for a fixed layer structure, `groups` independent
    batches of `group_batch` rows stacked along M inside one block.

    Ref order:
      x, W_0, ..., W_{num_bn-1}, [W_last if not fuse_last], param_slab, out

    param_slab rows (each padded to max_F lanes):
      2*i   : gamma_i  (width bn_widths[i])
      2*i+1 : beta_i   (width bn_widths[i])
      then, if fuse_last (out_dim == 1):
        2*num_bn     : W_last as a row (width last_hidden)
        2*num_bn + 1 : b_last          (width 1)
      else:
        2*num_bn     : b_last          (width out_dim)
    """
    inv_n = 1.0 / float(group_batch)
    m_block = groups * group_batch

    def kernel(*refs):
        x_ref = refs[0]
        out_ref = refs[-1]
        slab_ref = refs[-2]
        w_refs = refs[1:1 + num_bn]
        w_last_ref = None if fuse_last else refs[1 + num_bn]

        h = x_ref[...].astype(jnp.float32)                  # (M, in_dim)

        for i in range(num_bn):
            f = bn_widths[i]
            # Linear (bias intentionally dropped: cancelled exactly by the BN below).
            h = jnp.dot(h, w_refs[i][...], preferred_element_type=jnp.float32)  # (M, f)

            # Per-group BatchNorm1d (training mode).  B % 8 == 0 keeps this reshape a
            # sublane-tile-aligned shape cast (no data movement).
            hg = h.reshape(groups, group_batch, f)           # (G, B, f)
            s1 = jnp.sum(hg, axis=1, keepdims=True)          # (G, 1, f) sublane reduce
            s2 = jnp.sum(hg * hg, axis=1, keepdims=True)     # independent reduce
            mean = s1 * inv_n
            # Clamp E[x^2]-E[x]^2 to >= 0: protects rsqrt from f32 cancellation.
            var = jnp.maximum(s2 * inv_n - mean * mean, 0.0)

            gamma = slab_ref[2 * i:2 * i + 1, :f].reshape(1, 1, f)
            beta = slab_ref[2 * i + 1:2 * i + 2, :f].reshape(1, 1, f)
            scale = gamma * jax.lax.rsqrt(var + EPS)          # EUP rsqrt
            shift = beta - mean * scale
            hg = hg * scale + shift                           # fused BN affine

            # LeakyReLU as a single vmax: max(h, 0.01*h) == leaky_relu(h).
            hg = jnp.maximum(hg, NEG_SLOPE * hg)

            h = hg.reshape(m_block, f)

        if fuse_last:
            # (H -> 1) as VPU multiply + lane reduce; avoids an N=1 MXU push/pop.
            w_row = slab_ref[2 * num_bn:2 * num_bn + 1, :last_hidden]      # (1, H)
            b_row = slab_ref[2 * num_bn + 1:2 * num_bn + 2, :1]            # (1, 1)
            logit = jnp.sum(h * w_row, axis=-1, keepdims=True) + b_row     # (M, 1)
        else:
            b_row = slab_ref[2 * num_bn:2 * num_bn + 1, :out_dim]
            logit = jnp.dot(h, w_last_ref[...],
                            preferred_element_type=jnp.float32) + b_row

        # Sigmoid: EUP exp + EUP approx reciprocal + one Newton step (f32 accuracy).
        # Clamp keeps exp finite (Newton would NaN on inf).
        z = jnp.exp(jnp.minimum(-logit, 80.0))
        d = 1.0 + z
        r = pl.reciprocal(d, approx=True)
        r = r * (2.0 - d * r)
        # TODO(synk): at very large G*B, emit the output lane-dense (e.g. transposed
        # (chunks, M_chunk) layout) to avoid masked vst.msk stores on the 1-lane column;
        # negligible at these sizes.
        out_ref[...] = r.astype(out_ref.dtype)

    return kernel


def discriminator_forward(x, params, *, group_chunks=1):
    """Forward pass.

    x: (B, in_dim)            -> (B, out_dim)          (original module semantics), or
       (G, B, in_dim)         -> (G, B, out_dim)       G independent batches fused into
                                                        one kernel call, stacked along M.
    group_chunks: split the G groups into this many grid steps (marked "parallel" so
                  v7x's two TensorCores can each take chunks; keep 1 on v5e/v6e).
    """
    ws = params["w"]
    num_bn = len(ws) - 1                      # all but the last linear have BN + act
    out_dim = int(ws[-1].shape[1])
    last_hidden = int(ws[-1].shape[0])
    bn_widths = [int(w.shape[1]) for w in ws[:-1]]
    fuse_last = (out_dim == 1)

    squeeze_group = (x.ndim == 2)
    x3 = x[None] if squeeze_group else x
    G, Bg, in_dim = (int(d) for d in x3.shape)
    # Tile-aligned per-group reshape inside the kernel (BatchNorm needs full per-group
    # batch statistics, so the batch axis itself cannot be tiled).
    assert G == 1 or Bg % 8 == 0, "grouped mode needs per-group batch % 8 == 0"
    assert group_chunks >= 1 and G % group_chunks == 0
    Gc = G // group_chunks
    M = G * Bg
    Mc = Gc * Bg

    x2 = x3.reshape(M, in_dim).astype(jnp.float32)

    # Pack all tiny per-feature rows into a single slab operand (one DMA).
    rows = []
    for i in range(num_bn):
        rows.append(params["gamma"][i])
        rows.append(params["beta"][i])
    if fuse_last:
        rows.append(ws[-1][:, 0])             # final weight as a (H,) row
        rows.append(params["b"][-1])          # final bias (1,)
    else:
        rows.append(params["b"][-1])          # final bias (out_dim,)
    max_f = max(int(r.shape[0]) for r in rows)
    slab = jnp.stack(
        [jnp.pad(r.astype(jnp.float32), (0, max_f - r.shape[0])) for r in rows]
    )

    inputs = [x2] + [w.astype(jnp.float32) for w in ws[:-1]]
    if not fuse_last:
        inputs.append(ws[-1].astype(jnp.float32))
    inputs.append(slab)

    # Block specs: x / out tiled along M by group-chunk, everything else full-resident.
    in_specs = [pl.BlockSpec((Mc, in_dim), lambda c: (c, 0))]
    for w in ws[:-1]:
        in_specs.append(pl.BlockSpec(tuple(int(d) for d in w.shape), lambda c: (0, 0)))
    if not fuse_last:
        in_specs.append(pl.BlockSpec(tuple(int(d) for d in ws[-1].shape),
                                     lambda c: (0, 0)))
    in_specs.append(pl.BlockSpec(tuple(int(d) for d in slab.shape), lambda c: (0, 0)))
    out_specs = pl.BlockSpec((Mc, out_dim), lambda c: (c, 0))

    # Full-VMEM-residency budget check (v7x physical VMEM = 64 MiB, half of v5e/v6e;
    # default scoped limit 16-32 MiB).  ~2x for double-buffered blocks + live h tiles.
    blk_bytes = (Mc * in_dim + sum(int(w.size) for w in ws) + int(slab.size)
                 + Mc * out_dim) * 4
    live_h = 4 * Mc * max(bn_widths + [in_dim, out_dim]) * 4
    assert 2 * blk_bytes + live_h < 12 * 2**20, (
        "working set too large for the full-VMEM-residency design; tile the group axis")

    # Advisory cost estimate so XLA can overlap this small call with neighboring HLO.
    chain = [in_dim] + bn_widths + [out_dim]
    mm_flops = 2 * M * sum(a * b for a, b in zip(chain[:-1], chain[1:]))
    ew_flops = 8 * M * sum(bn_widths)
    cost = pl.CostEstimate(
        flops=mm_flops + ew_flops,
        transcendentals=2 * M * out_dim + G * sum(bn_widths),
        bytes_accessed=sum(int(a.size) * 4 for a in inputs) + M * out_dim * 4,
    )

    kernel = _make_discriminator_kernel(
        num_bn, bn_widths, out_dim, last_hidden, Gc, Bg, fuse_last
    )

    # TODO(synk): for real training throughput, fuse this forward into the surrounding
    # step kernel (consume the generator's output directly) instead of a standalone call.
    out2 = pl.pallas_call(
        kernel,
        out_shape=jax.ShapeDtypeStruct((M, out_dim), jnp.float32),
        grid=(group_chunks,),
        in_specs=in_specs,
        out_specs=out_specs,
        compiler_params=pltpu.CompilerParams(dimension_semantics=("parallel",)),
        cost_estimate=cost,
    )(*inputs)

    out3 = out2.reshape(G, Bg, out_dim)
    return out3[0] if squeeze_group else out3


def init_discriminator_params(key, in_dim, hidden_dims, out_dim):
    """Matches nn.Linear U(-1/sqrt(fan_in), 1/sqrt(fan_in)) and BN gamma=1/beta=0."""
    dims = [in_dim] + list(hidden_dims) + [out_dim]
    ws, bs, gs, betas = [], [], [], []
    for i in range(len(dims) - 1):
        fan_in, fan_out = dims[i], dims[i + 1]
        key, kw, kb = jax.random.split(key, 3)
        bound = 1.0 / (fan_in ** 0.5)
        # stored as (in, out) == PyTorch weight.T
        ws.append(jax.random.uniform(kw, (fan_in, fan_out), jnp.float32, -bound, bound))
        bs.append(jax.random.uniform(kb, (fan_out,), jnp.float32, -bound, bound))
        if i < len(dims) - 2:  # BN only on first + hidden layers
            gs.append(jnp.ones((fan_out,), jnp.float32))
            betas.append(jnp.zeros((fan_out,), jnp.float32))
    return {"w": ws, "b": bs, "gamma": gs, "beta": betas}


def _reference_forward(x, params):
    """Pure-JAX reference with exact PyTorch semantics (biases + exact sigmoid)."""
    num_bn = len(params["w"]) - 1
    h = x
    for i in range(num_bn):
        h = h @ params["w"][i] + params["b"][i]
        mean = jnp.mean(h, axis=0, keepdims=True)
        var = jnp.mean((h - mean) ** 2, axis=0, keepdims=True)
        h = (h - mean) / jnp.sqrt(var + EPS) * params["gamma"][i] + params["beta"][i]
        h = jnp.where(h >= 0, h, NEG_SLOPE * h)
    h = h @ params["w"][-1] + params["b"][-1]
    return jax.nn.sigmoid(h)


if __name__ == "__main__":
    # Discriminator(in_dim=16, hidden_dims=[32, 32], out_dim=1).
    # 16 independent batches of 8 stacked along M -> 128-row matmuls per layer.
    in_dim, hidden_dims, out_dim = 16, [32, 32], 1
    G, Bg = 16, 8

    key = jax.random.PRNGKey(0)
    key, kx = jax.random.split(key)
    x = jax.random.normal(kx, (G, Bg, in_dim), jnp.float32)
    params = init_discriminator_params(key, in_dim, hidden_dims, out_dim)

    ref = jax.vmap(lambda xb: _reference_forward(xb, params))(x)

    # Grouped call, single grid step (fills MXU with M = 128 rows).
    out1 = jax.block_until_ready(discriminator_forward(x, params))
    assert out1.shape == (G, Bg, out_dim), out1.shape
    assert jnp.allclose(out1, ref, atol=1e-4, rtol=1e-4)

    # Same problem split over a 2-step "parallel" grid (v7x megacore sharding path).
    out2 = jax.block_until_ready(discriminator_forward(x, params, group_chunks=2))
    assert jnp.allclose(out2, ref, atol=1e-4, rtol=1e-4)

    # Plain single-batch call: exactly the original module's forward.
    xb = x[0]
    out_single = jax.block_until_ready(discriminator_forward(xb, params))
    assert out_single.shape == (Bg, out_dim), out_single.shape
    assert jnp.allclose(out_single, _reference_forward(xb, params), atol=1e-4, rtol=1e-4)

    print("KERNEL_OK")
</pallas_src>

<mosaic_0001>
module attributes {stable_mosaic.version = 11 : i64} {
  func.func @kernel(%arg0: i32, %arg1: memref<128x16xf32, #tpu.memory_space<vmem>>, %arg2: memref<16x32xf32, #tpu.memory_space<vmem>>, %arg3: memref<32x32xf32, #tpu.memory_space<vmem>>, %arg4: memref<6x32xf32, #tpu.memory_space<vmem>>, %arg5: memref<128x1xf32, #tpu.memory_space<vmem>>) attributes {dimension_semantics = [#tpu.dimension_semantics<parallel>], iteration_bounds = array<i64: 1>, scalar_prefetch = 0 : i64, scratch_operands = 0 : i64, tpu.core_type = #tpu.core_type<tc>, window_params = [{transform_indices = @transform_0, window_bounds = array<i64: 128, 16>}, {pipeline_mode = #tpu.pipeline_mode<synchronous>, transform_indices = @transform_1, window_bounds = array<i64: 16, 32>}, {pipeline_mode = #tpu.pipeline_mode<synchronous>, transform_indices = @transform_2, window_bounds = array<i64: 32, 32>}, {pipeline_mode = #tpu.pipeline_mode<synchronous>, transform_indices = @transform_3, window_bounds = array<i64: 6, 32>}, {transform_indices = @transform_4, window_bounds = array<i64: 128, 1>}]} {
    %c0 = arith.constant 0 : index
    %c0_0 = arith.constant 0 : index
    %0 = vector.load %arg1[%c0, %c0_0] : memref<128x16xf32, #tpu.memory_space<vmem>>, vector<128x16xf32>
    %c0_1 = arith.constant 0 : index
    %c0_2 = arith.constant 0 : index
    %1 = vector.load %arg2[%c0_1, %c0_2] : memref<16x32xf32, #tpu.memory_space<vmem>>, vector<16x32xf32>
    %cst = arith.constant dense<0.000000e+00> : vector<128x32xf32>
    %2 = tpu.matmul %0, %1, %cst {dimension_numbers = #tpu.dot_dimension_numbers<[1], [0], [0], [1], [0, 0, 1, 1], [], []>} : vector<128x16xf32>, vector<16x32xf32>, vector<128x32xf32> -> vector<128x32xf32>
    %3 = vector.shape_cast %2 : vector<128x32xf32> to vector<16x8x32xf32>
    %cst_3 = arith.constant dense<0.000000e+00> : vector<16x32xf32>
    %4 = vector.multi_reduction <add>, %3, %cst_3 [1] : vector<16x8x32xf32> to vector<16x32xf32>
    %5 = vector.shape_cast %4 : vector<16x32xf32> to vector<16x1x32xf32>
    %6 = arith.mulf %3, %3 : vector<16x8x32xf32>
    %cst_4 = arith.constant dense<0.000000e+00> : vector<16x32xf32>
    %7 = vector.multi_reduction <add>, %6, %cst_4 [1] : vector<16x8x32xf32> to vector<16x32xf32>
    %8 = vector.shape_cast %7 : vector<16x32xf32> to vector<16x1x32xf32>
    %cst_5 = arith.constant 1.250000e-01 : f32
    %9 = vector.broadcast %cst_5 : f32 to vector<16x1x32xf32>
    %10 = arith.mulf %5, %9 : vector<16x1x32xf32>
    %cst_6 = arith.constant 1.250000e-01 : f32
    %11 = vector.broadcast %cst_6 : f32 to vector<16x1x32xf32>
    %12 = arith.mulf %8, %11 : vector<16x1x32xf32>
    %13 = arith.mulf %10, %10 : vector<16x1x32xf32>
    %14 = arith.subf %12, %13 : vector<16x1x32xf32>
    %cst_7 = arith.constant 0.000000e+00 : f32
    %15 = vector.broadcast %cst_7 : f32 to vector<16x1x32xf32>
    %16 = arith.maximumf %14, %15 : vector<16x1x32xf32>
    %c0_8 = arith.constant 0 : index
    %c0_9 = arith.constant 0 : index
    %17 = vector.load %arg4[%c0_8, %c0_9] : memref<6x32xf32, #tpu.memory_space<vmem>>, vector<1x32xf32>
    %18 = vector.shape_cast %17 : vector<1x32xf32> to vector<1x1x32xf32>
    %c1 = arith.constant 1 : index
    %c0_10 = arith.constant 0 : index
    %19 = vector.load %arg4[%c1, %c0_10] : memref<6x32xf32, #tpu.memory_space<vmem>>, vector<1x32xf32>
    %20 = vector.shape_cast %19 : vector<1x32xf32> to vector<1x1x32xf32>
    %cst_11 = arith.constant 9.99999974E-6 : f32
    %21 = vector.broadcast %cst_11 : f32 to vector<16x1x32xf32>
    %22 = arith.addf %16, %21 : vector<16x1x32xf32>
    %23 = math.rsqrt %22 : vector<16x1x32xf32>
    %24 = vector.broadcast %18 : vector<1x1x32xf32> to vector<16x1x32xf32>
    %25 = arith.mulf %24, %23 : vector<16x1x32xf32>
    %26 = arith.mulf %10, %25 : vector<16x1x32xf32>
    %27 = vector.broadcast %20 : vector<1x1x32xf32> to vector<16x1x32xf32>
    %28 = arith.subf %27, %26 : vector<16x1x32xf32>
    %29 = vector.broadcast %25 : vector<16x1x32xf32> to vector<16x8x32xf32>
    %30 = arith.mulf %3, %29 : vector<16x8x32xf32>
    %31 = vector.broadcast %28 : vector<16x1x32xf32> to vector<16x8x32xf32>
    %32 = arith.addf %30, %31 : vector<16x8x32xf32>
    %cst_12 = arith.constant 0.00999999977 : f32
    %33 = vector.broadcast %cst_12 : f32 to vector<16x8x32xf32>
    %34 = arith.mulf %33, %32 : vector<16x8x32xf32>
    %35 = arith.maximumf %32, %34 : vector<16x8x32xf32>
    %36 = vector.shape_cast %35 : vector<16x8x32xf32> to vector<128x32xf32>
    %c0_13 = arith.constant 0 : index
    %c0_14 = arith.constant 0 : index
    %37 = vector.load %arg3[%c0_13, %c0_14] : memref<32x32xf32, #tpu.memory_space<vmem>>, vector<32x32xf32>
    %cst_15 = arith.constant dense<0.000000e+00> : vector<128x32xf32>
    %38 = tpu.matmul %36, %37, %cst_15 {dimension_numbers = #tpu.dot_dimension_numbers<[1], [0], [0], [1], [0, 0, 1, 1], [], []>} : vector<128x32xf32>, vector<32x32xf32>, vector<128x32xf32> -> vector<128x32xf32>
    %39 = vector.shape_cast %38 : vector<128x32xf32> to vector<16x8x32xf32>
    %cst_16 = arith.constant dense<0.000000e+00> : vector<16x32xf32>
    %40 = vector.multi_reduction <add>, %39, %cst_16 [1] : vector<16x8x32xf32> to vector<16x32xf32>
    %41 = vector.shape_cast %40 : vector<16x32xf32> to vector<16x1x32xf32>
    %42 = arith.mulf %39, %39 : vector<16x8x32xf32>
    %cst_17 = arith.constant dense<0.000000e+00> : vector<16x32xf32>
    %43 = vector.multi_reduction <add>, %42, %cst_17 [1] : vector<16x8x32xf32> to vector<16x32xf32>
    %44 = vector.shape_cast %43 : vector<16x32xf32> to vector<16x1x32xf32>
    %cst_18 = arith.constant 1.250000e-01 : f32
    %45 = vector.broadcast %cst_18 : f32 to vector<16x1x32xf32>
    %46 = arith.mulf %41, %45 : vector<16x1x32xf32>
    %cst_19 = arith.constant 1.250000e-01 : f32
    %47 = vector.broadcast %cst_19 : f32 to vector<16x1x32xf32>
    %48 = arith.mulf %44, %47 : vector<16x1x32xf32>
    %49 = arith.mulf %46, %46 : vector<16x1x32xf32>
    %50 = arith.subf %48, %49 : vector<16x1x32xf32>
    %cst_20 = arith.constant 0.000000e+00 : f32
    %51 = vector.broadcast %cst_20 : f32 to vector<16x1x32xf32>
    %52 = arith.maximumf %50, %51 : vector<16x1x32xf32>
    %c2 = arith.constant 2 : index
    %c0_21 = arith.constant 0 : index
    %53 = vector.load %arg4[%c2, %c0_21] : memref<6x32xf32, #tpu.memory_space<vmem>>, vector<1x32xf32>
    %54 = vector.shape_cast %53 : vector<1x32xf32> to vector<1x1x32xf32>
    %c3 = arith.constant 3 : index
    %c0_22 = arith.constant 0 : index
    %55 = vector.load %arg4[%c3, %c0_22] : memref<6x32xf32, #tpu.memory_space<vmem>>, vector<1x32xf32>
    %56 = vector.shape_cast %55 : vector<1x32xf32> to vector<1x1x32xf32>
    %cst_23 = arith.constant 9.99999974E-6 : f32
    %57 = vector.broadcast %cst_23 : f32 to vector<16x1x32xf32>
    %58 = arith.addf %52, %57 : vector<16x1x32xf32>
    %59 = math.rsqrt %58 : vector<16x1x32xf32>
    %60 = vector.broadcast %54 : vector<1x1x32xf32> to vector<16x1x32xf32>
    %61 = arith.mulf %60, %59 : vector<16x1x32xf32>
    %62 = arith.mulf %46, %61 : vector<16x1x32xf32>
    %63 = vector.broadcast %56 : vector<1x1x32xf32> to vector<16x1x32xf32>
    %64 = arith.subf %63, %62 : vector<16x1x32xf32>
    %65 = vector.broadcast %61 : vector<16x1x32xf32> to vector<16x8x32xf32>
    %66 = arith.mulf %39, %65 : vector<16x8x32xf32>
    %67 = vector.broadcast %64 : vector<16x1x32xf32> to vector<16x8x32xf32>
    %68 = arith.addf %66, %67 : vector<16x8x32xf32>
    %cst_24 = arith.constant 0.00999999977 : f32
    %69 = vector.broadcast %cst_24 : f32 to vector<16x8x32xf32>
    %70 = arith.mulf %69, %68 : vector<16x8x32xf32>
    %71 = arith.maximumf %68, %70 : vector<16x8x32xf32>
    %72 = vector.shape_cast %71 : vector<16x8x32xf32> to vector<128x32xf32>
    %c4 = arith.constant 4 : index
    %c0_25 = arith.constant 0 : index
    %73 = vector.load %arg4[%c4, %c0_25] : memref<6x32xf32, #tpu.memory_space<vmem>>, vector<1x32xf32>
    %c5 = arith.constant 5 : index
    %c0_26 = arith.constant 0 : index
    %74 = vector.load %arg4[%c5, %c0_26] : memref<6x32xf32, #tpu.memory_space<vmem>>, vector<1x1xf32>
    %75 = vector.broadcast %73 : vector<1x32xf32> to vector<128x32xf32>
    %76 = arith.mulf %72, %75 : vector<128x32xf32>
    %cst_27 = arith.constant dense<0.000000e+00> : vector<128xf32>
    %77 = vector.multi_reduction <add>, %76, %cst_27 [1] : vector<128x32xf32> to vector<128xf32>
    %78 = vector.shape_cast %77 : vector<128xf32> to vector<128x1xf32>
    %79 = vector.broadcast %74 : vector<1x1xf32> to vector<128x1xf32>
    %80 = arith.addf %78, %79 : vector<128x1xf32>
    %cst_28 = arith.constant 0.000000e+00 : f32
    %81 = vector.broadcast %cst_28 : f32 to vector<128x1xf32>
    %82 = arith.subf %81, %80 : vector<128x1xf32>
    %cst_29 = arith.constant 8.000000e+01 : f32
    %83 = vector.broadcast %cst_29 : f32 to vector<128x1xf32>
    %84 = arith.minimumf %82, %83 : vector<128x1xf32>
    %85 = math.exp %84 : vector<128x1xf32>
    %cst_30 = arith.constant 1.000000e+00 : f32
    %86 = vector.broadcast %cst_30 : f32 to vector<128x1xf32>
    %87 = arith.addf %86, %85 : vector<128x1xf32>
    %88 = tpu.reciprocal %87 {approx = true} : vector<128x1xf32> -> vector<128x1xf32>
    %89 = arith.mulf %87, %88 : vector<128x1xf32>
    %cst_31 = arith.constant 2.000000e+00 : f32
    %90 = vector.broadcast %cst_31 : f32 to vector<128x1xf32>
    %91 = arith.subf %90, %89 : vector<128x1xf32>
    %92 = arith.mulf %88, %91 : vector<128x1xf32>
    %c0_32 = arith.constant 0 : index
    %c0_33 = arith.constant 0 : index
    %93 = vector.load %arg5[%c0_32, %c0_33] : memref<128x1xf32, #tpu.memory_space<vmem>>, vector<128x1xf32>
    tpu.vector_store %arg5[%c0_32, %c0_33], %92 {strides = array<i32>} : memref<128x1xf32, #tpu.memory_space<vmem>>, vector<128x1xf32>,
    return
  }
  func.func @transform_0(%arg0: i32) -> (i32, i32) {
    %c0_i32 = arith.constant 0 : i32
    %c0_i32_0 = arith.constant 0 : i32
    return %arg0, %c0_i32 : i32, i32
  }
  func.func @transform_1(%arg0: i32) -> (i32, i32) {
    %c0_i32 = arith.constant 0 : i32
    %c0_i32_0 = arith.constant 0 : i32
    %c0_i32_1 = arith.constant 0 : i32
    return %c0_i32, %c0_i32_0 : i32, i32
  }
  func.func @transform_2(%arg0: i32) -> (i32, i32) {
    %c0_i32 = arith.constant 0 : i32
    %c0_i32_0 = arith.constant 0 : i32
    %c0_i32_1 = arith.constant 0 : i32
    return %c0_i32, %c0_i32_0 : i32, i32
  }
  func.func @transform_3(%arg0: i32) -> (i32, i32) {
    %c0_i32 = arith.constant 0 : i32
    %c0_i32_0 = arith.constant 0 : i32
    %c0_i32_1 = arith.constant 0 : i32
    return %c0_i32, %c0_i32_0 : i32, i32
  }
  func.func @transform_4(%arg0: i32) -> (i32, i32) {
    %c0_i32 = arith.constant 0 : i32
    %c0_i32_0 = arith.constant 0 : i32
    return %arg0, %c0_i32 : i32, i32
  }
}

</mosaic_0001>

<bundles_post_ra>
// kernel: tpu_custom_call.1
= control target key start
LH: loop header
LB: loop body
LE: loop exit
PB: predicated region body
PF: predicated region fallthrough
CT: control target
= control target key end

     0   :  { %vm35_vm0 = vcmask 130048   ;;  %vm229_vm1 = vcmask 261120   ;;  %vm1849_vm2 = vcmask 7168   ;;  %s3065_s1 = inlined_call_operand.vmem [shape: f32[16,32], index: 1, kind: input, shape index: {}]   ;;  %s3066_s0 = inlined_call_operand.vmem [shape: f32[128,16], index: 0, kind: input, shape index: {}]   ;;  %s3067_s2 = inlined_call_operand.vmem [shape: f32[32,32], index: 2, kind: input, shape index: {}]   ;;  %s3068_s3 = inlined_call_operand.vmem [shape: f32[6,32], index: 3, kind: input, shape index: {}]   ;;  %s3069_s4 = inlined_call_operand.vmem [shape: f32[128,1], index: 4, kind: output, shape index: {}]  }
   0x1   :  { %v34_v0 = vld [vmem:[%s3065_s1 + $0x8] sm:$0xff]  ;;  %v33_v1 = vld [vmem:[%s3065_s1] sm:$0xff]  ;;  %v19_v4 = vld [vmem:[%s3066_s0 + $0x10] sm:$0xff] }
   0x2   :  { %v17_v2 = vld [vmem:[%s3066_s0] sm:$0xff]  ;;  %1942 = vmatprep.subr.mxu0 %v34_v0  ;;  %v18_v3 = vld [vmem:[%s3066_s0 + $0x8] sm:$0xff]  ;;  %v20_v5 = vld [vmem:[%s3066_s0 + $0x18] sm:$0xff] }
   0x3   :  { %1946 = vmatprep.mubr.msk.f32.mxu0 %vm35_vm0, %v17_v2  ;;  %1943 = vmatpush3.msra.mxu0 %v34_v0  ;;  %v21_v6 = vld [vmem:[%s3066_s0 + $0x20] sm:$0xff]  ;;  %v22_v7 = vld [vmem:[%s3066_s0 + $0x28] sm:$0xff]  ;;  %v23_v8 = vld [vmem:[%s3066_s0 + $0x30] sm:$0xff] }
   0x4   :  { %1944 = vmatprep.subr.mxu0 %v33_v1  ;;  %v24_v9 = vld [vmem:[%s3066_s0 + $0x38] sm:$0xff]  ;;  %v25_v10 = vld [vmem:[%s3066_s0 + $0x40] sm:$0xff]  ;;  %v26_v11 = vld [vmem:[%s3066_s0 + $0x48] sm:$0xff] }
   0x5   :  { %1945 = vmatpush3.msra.mxu0 %v33_v1  ;;  %v27_v12 = vld [vmem:[%s3066_s0 + $0x50] sm:$0xff]  ;;  %v28_v13 = vld [vmem:[%s3066_s0 + $0x58] sm:$0xff]  ;;  %v29_v14 = vld [vmem:[%s3066_s0 + $0x60] sm:$0xff] }
   0x6   :  { %1947 = vmatmul.mubr.msk.f32.vlgmr.msra.gmra.mxu0 %vm35_vm0, %v18_v3  ;;  %v30_v15 = vld [vmem:[%s3066_s0 + $0x68] sm:$0xff]  ;;  %v31_v16 = vld [vmem:[%s3066_s0 + $0x70] sm:$0xff]  ;;  %v32_v17 = vld [vmem:[%s3066_s0 + $0x78] sm:$0xff] }
   0x7   :  { %1949 = vmatprep.mubr.msk.f32.mxu0 %vm35_vm0, %v19_v4  ;;  %v827_v18 = vld [vmem:[%s3067_s2 + $0x18] sm:$0xff]  ;;  %v826_v19 = vld [vmem:[%s3067_s2 + $0x10] sm:$0xff]  ;;  %v825_v20 = vld [vmem:[%s3067_s2 + $0x8] sm:$0xff] }
   0x8   :  { %1970 = vmatprep.subr.mxu1 %v827_v18  ;;  %v824_v21 = vld [vmem:[%s3067_s2] sm:$0xff] }
   0x9   :  { %1971 = vmatpush3.msra.mxu1 %v827_v18 }
   0xa   :  { %1950 = vmatmul.mubr.msk.f32.gmra.mxu0 %vm35_vm0, %v20_v5  ;;  %1972 = vmatprep.subr.mxu1 %v826_v19 }
   0xb   :  { %1952 = vmatprep.mubr.msk.f32.mxu0 %vm35_vm0, %v21_v6  ;;  %1973 = vmatpush3.msra.mxu1 %v826_v19 }
   0xc   :  { %1974 = vmatprep.subr.mxu1 %v825_v20 }
   0xd   :  { %1975 = vmatpush3.msra.mxu1 %v825_v20 }
   0xe   :  { %1953 = vmatmul.mubr.msk.f32.gmra.mxu0 %vm35_vm0, %v22_v7  ;;  %1976 = vmatprep.subr.mxu1 %v824_v21 }
   0xf   :  { %1955 = vmatprep.mubr.msk.f32.mxu0 %vm35_vm0, %v23_v8  ;;  %1977 = vmatpush3.msra.mxu1 %v824_v21 }
  0x12   :  { %1956 = vmatmul.mubr.msk.f32.gmra.mxu0 %vm35_vm0, %v24_v9 }
  0x13   :  { %1958 = vmatprep.mubr.msk.f32.mxu0 %vm35_vm0, %v25_v10 }
  0x16   :  { %1959 = vmatmul.mubr.msk.f32.gmra.mxu0 %vm35_vm0, %v26_v11 }
  0x17   :  { %1961 = vmatprep.mubr.msk.f32.mxu0 %vm35_vm0, %v27_v12 }
  0x1a   :  { %1962 = vmatmul.mubr.msk.f32.gmra.mxu0 %vm35_vm0, %v28_v13 }
  0x1b   :  { %1964 = vmatprep.mubr.msk.f32.mxu0 %vm35_vm0, %v29_v14 }
  0x1e   :  { %1965 = vmatmul.mubr.msk.f32.gmra.mxu0 %vm35_vm0, %v30_v15 }
  0x1f   :  { %1967 = vmatprep.mubr.msk.f32.mxu0 %vm35_vm0, %v31_v16 }
  0x22   :  { %1968 = vmatmul.mubr.msk.f32.gmra.mxu0 %vm35_vm0, %v32_v17 }
  0xc6   :  { %v2237_v22 = vpop.f32.mrf.mxu0 }
  0xc7   :  { %v237_v23 = vsel %vm229_vm1, %v2237_v22, 0.0  ;;  %v343_v24 = vmul.f32 %v2237_v22, %v2237_v22 }
  0xc8   :  { %v238_v25 = vrot.slane %v237_v23, 4  ;;  %v2243_v26 = vpop.f32.mrf.mxu0 }
  0xc9   :  { %v365_v27 = vsel %vm229_vm1, %v343_v24, 0.0  ;;  %v230_v28 = vsel %vm229_vm1, %v2243_v26, 0.0  ;;  %v342_v29 = vmul.f32 %v2243_v26, %v2243_v26 }
  0xca   :  { %v239_v30 = vadd.f32 %v238_v25, %v237_v23  ;;  %v366_v31 = vrot.slane %v365_v27, 4  ;;  %v231_v32 = vrot.slane %v230_v28, 4  ;;  %v2250_v33 = vpop.f32.mrf.mxu0 }
  0xcb   :  { %v358_v34 = vsel %vm229_vm1, %v342_v29, 0.0  ;;  %v251_v35 = vsel %vm229_vm1, %v2250_v33, 0.0  ;;  %v345_v36 = vmul.f32 %v2250_v33, %v2250_v33 }
  0xcc   :  { %v240_v37 = vrot.slane %v239_v30, 2  ;;  %v367_v38 = vadd.f32 %v366_v31, %v365_v27  ;;  %v232_v39 = vadd.f32 %v231_v32, %v230_v28  ;;  %v359_v40 = vrot.slane %v358_v34, 4  ;;  %v2257_v41 = vpop.f32.mrf.mxu0 }
  0xcd   :  { %v252_v42 = vrot.slane %v251_v35, 4  ;;  %v379_v43 = vsel %vm229_vm1, %v345_v36, 0.0  ;;  %v244_v44 = vsel %vm229_vm1, %v2257_v41, 0.0  ;;  %v344_v45 = vmul.f32 %v2257_v41, %v2257_v41 }
  0xce   :  { %v241_v46 = vadd.f32 %v240_v37, %v239_v30  ;;  %v368_v47 = vrot.slane %v367_v38, 2  ;;  %v233_v48 = vrot.slane %v232_v39, 2  ;;  %v360_v49 = vadd.f32 %v359_v40, %v358_v34  ;;  %v2267_v14 = vpop.f32.mrf.mxu0 }
  0xcf   :  { %v253_v50 = vadd.f32 %v252_v42, %v251_v35  ;;  %v380_v51 = vrot.slane %v379_v43, 4  ;;  %v245_v52 = vrot.slane %v244_v44, 4  ;;  %v372_v53 = vsel %vm229_vm1, %v344_v45, 0.0 }
  0xd0   :  { %v242_v54 = vrot.slane %v241_v46, 1  ;;  %v369_v55 = vadd.f32 %v368_v47, %v367_v38  ;;  %v234_v56 = vadd.f32 %v233_v48, %v232_v39  ;;  %v361_v57 = vrot.slane %v360_v49, 2  ;;  %v2279_v34 = vpop.f32.mrf.mxu0 }
  0xd1   :  { %v254_v58 = vrot.slane %v253_v50, 2  ;;  %v381_v59 = vadd.f32 %v380_v51, %v379_v43  ;;  %v246_v60 = vadd.f32 %v245_v52, %v244_v44  ;;  %v373_v61 = vrot.slane %v372_v53, 4 }
  0xd2   :  { %v243_v62 = vadd.f32 %v242_v54, %v241_v46  ;;  %v370_v63 = vrot.slane %v369_v55, 1  ;;  %v235_v0 = vrot.slane %v234_v56, 1  ;;  %v362_v1 = vadd.f32 %v361_v57, %v360_v49  ;;  %v2290_v52 = vpop.f32.mrf.mxu0 }
  0xd3   :  { %v255_v2 = vadd.f32 %v254_v58, %v253_v50  ;;  %v382_v3 = vrot.slane %v381_v59, 2  ;;  %v247_v4 = vrot.slane %v246_v60, 2  ;;  %v374_v5 = vadd.f32 %v373_v61, %v372_v53 }
  0xd4   :  { %v371_v6 = vadd.f32 %v370_v63, %v369_v55  ;;  %v2265_v7 = vmul.f32 0.125, %v243_v62  ;;  %v236_v8 = vadd.f32 %v235_v0, %v234_v56  ;;  %v363_v9 = vrot.slane %v362_v1, 1 }
  0xd5   :  { %v256_v10 = vrot.slane %v255_v2, 1  ;;  %v383_v11 = vadd.f32 %v382_v3, %v381_v59  ;;  %v248_v12 = vadd.f32 %v247_v4, %v246_v60  ;;  %v375_v13 = vrot.slane %v374_v5, 2 }
  0xd6   :  { %v487_v15 = vmul.f32 0.125, %v371_v6  ;;  %v503_v16 = vmul.f32 %v2265_v7, %v2265_v7  ;;  %v364_v17 = vadd.f32 %v363_v9, %v362_v1  ;;  %v2271_v18 = vmul.f32 0.125, %v236_v8 }
  0xd7   :  { %v257_v19 = vadd.f32 %v256_v10, %v255_v2  ;;  %v384_v20 = vrot.slane %v383_v11, 1  ;;  %v249_v21 = vrot.slane %v248_v12, 1  ;;  %v376_v23 = vadd.f32 %v375_v13, %v374_v5 }
  0xd8   :  { %v519_v24 = vsub.f32 %v487_v15, %v503_v16  ;;  %v486_v25 = vmul.f32 0.125, %v364_v17  ;;  %v502_v27 = vmul.f32 %v2271_v18, %v2271_v18  ;;  %v265_v28 = vsel %vm229_vm1, %v2267_v14, 0.0 }
  0xd9   :  { %v385_v29 = vadd.f32 %v384_v20, %v383_v11  ;;  %v2277_v30 = vmul.f32 0.125, %v257_v19  ;;  %v250_v31 = vadd.f32 %v249_v21, %v248_v12  ;;  %v377_v32 = vrot.slane %v376_v23, 1  ;;  %v2301_v11 = vpop.f32.mrf.mxu0 }
  0xda   :  { %v535_v35 = vmax.f32 %v519_v24, 0.0  ;;  %v518_v36 = vsub.f32 %v486_v25, %v502_v27  ;;  %v266_v37 = vrot.slane %v265_v28, 4  ;;  %v347_v38 = vmul.f32 %v2267_v14, %v2267_v14 }
  0xdb   :  { %v489_v39 = vmul.f32 0.125, %v385_v29  ;;  %v505_v40 = vmul.f32 %v2277_v30, %v2277_v30  ;;  %v378_v42 = vadd.f32 %v377_v32, %v376_v23  ;;  %v2285_v43 = vmul.f32 0.125, %v250_v31 }
  0xdc   :  { %v553_v44 = vadd.f32 1e-05, %v535_v35  ;;  %v534_v45 = vmax.f32 %v518_v36, 0.0  ;;  %v267_v46 = vadd.f32 %v266_v37, %v265_v28  ;;  %v393_v47 = vsel %vm229_vm1, %v347_v38, 0.0 }
  0xdd   :  { %v521_v48 = vsub.f32 %v489_v39, %v505_v40  ;;  %v488_v49 = vmul.f32 0.125, %v378_v42  ;;  %v504_v50 = vmul.f32 %v2285_v43, %v2285_v43  ;;  %v394_v51 = vrot.slane %v393_v47, 4 }
  0xde   :  { %2002 = vrsqrt.f32 %v553_v44  ;;  %v552_v53 = vadd.f32 1e-05, %v534_v45  ;;  %v268_v54 = vrot.slane %v267_v46, 2  ;;  %v258_v55 = vsel %vm229_vm1, %v2279_v34, 0.0 }
  0xdf   :  { %v537_v56 = vmax.f32 %v521_v48, 0.0  ;;  %v520_v57 = vsub.f32 %v488_v49, %v504_v50  ;;  %v395_v58 = vadd.f32 %v394_v51, %v393_v47  ;;  %v259_v59 = vrot.slane %v258_v55, 4  ;;  %v2315_v50 = vld [vmem:[%s3068_s3] sm:$0x1] }
  0xe0   :  { %2004 = vrsqrt.f32 %v552_v53  ;;  %v269_v60 = vadd.f32 %v268_v54, %v267_v46  ;;  %v346_v61 = vmul.f32 %v2279_v34, %v2279_v34  ;;  %v279_v62 = vsel %vm229_vm1, %v2290_v52, 0.0 }
  0xe1   :  { %v555_v63 = vadd.f32 1e-05, %v537_v56  ;;  %v536_v0 = vmax.f32 %v520_v57, 0.0  ;;  %v396_v1 = vrot.slane %v395_v58, 2  ;;  %v260_v2 = vadd.f32 %v259_v59, %v258_v55 }
  0xe2   :  { %v270_v3 = vrot.slane %v269_v60, 1  ;;  %v386_v4 = vsel %vm229_vm1, %v346_v61, 0.0  ;;  %v280_v5 = vrot.slane %v279_v62, 4  ;;  %v349_v6 = vmul.f32 %v2290_v52, %v2290_v52 }
  0xe3   :  { %v632_v8 = vlaneseq  ;;  %2006 = vrsqrt.f32 %v555_v63  ;;  %v397_v9 = vadd.f32 %v396_v1, %v395_v58  ;;  %v261_v10 = vrot.slane %v260_v2, 2 }
  0xe4   :  { %v271_v12 = vadd.f32 %v270_v3, %v269_v60  ;;  %v387_v13 = vrot.slane %v386_v4, 4  ;;  %v281_v15 = vadd.f32 %v280_v5, %v279_v62  ;;  %v407_v16 = vsel %vm229_vm1, %v349_v6, 0.0  ;;  %v2325_v5 = vpop.f32.mrf.mxu0 }
  0xe5   :  { %v554_v17 = vadd.f32 1e-05, %v536_v0  ;;  %v398_v19 = vrot.slane %v397_v9, 1  ;;  %v262_v20 = vadd.f32 %v261_v10, %v260_v2  ;;  %v408_v21 = vrot.slane %v407_v16, 4 }
  0xe6   :  { %v2304_v23 = vmul.f32 0.125, %v271_v12  ;;  %v388_v24 = vadd.f32 %v387_v13, %v386_v4  ;;  %v282_v25 = vrot.slane %v281_v15, 2  ;;  %v272_v27 = vsel %vm229_vm1, %v2301_v11, 0.0  ;;  %v2334_v12 = vld [vmem:[%s3068_s3 + $0x1] sm:$0x1] }
  0xe7   :  { %v399_v28 = vadd.f32 %v398_v19, %v397_v9  ;;  %v263_v29 = vrot.slane %v262_v20, 1  ;;  %v409_v31 = vadd.f32 %v408_v21, %v407_v16  ;;  %v273_v32 = vrot.slane %v272_v27, 4 }
  0xe8   :  { %v507_v35 = vmul.f32 %v2304_v23, %v2304_v23  ;;  %v389_v36 = vrot.slane %v388_v24, 2  ;;  %v283_v37 = vadd.f32 %v282_v25, %v281_v15  ;;  %v348_v38 = vmul.f32 %v2301_v11, %v2301_v11 }
  0xe9   :  { %v491_v39 = vmul.f32 0.125, %v399_v28  ;;  %v264_v40 = vadd.f32 %v263_v29, %v262_v20  ;;  %v410_v42 = vrot.slane %v409_v31, 2  ;;  %v274_v44 = vadd.f32 %v273_v32, %v272_v27 }
  0xea   :  { %2008 = vrsqrt.f32 %v554_v17  ;;  %v390_v45 = vadd.f32 %v389_v36, %v388_v24  ;;  %v633_v47 = vshrl.u32 %v632_v8, 7  ;;  %v284_v53 = vrot.slane %v283_v37, 1  ;;  %v2346_v24 = vpop.f32.mrf.mxu0 }
  0xeb   :  { %v2003_v46 = vpop.eup %2002  ;;  %v523_v48 = vsub.f32 %v491_v39, %v507_v35  ;;  %v275_v49 = vrot.slane %v274_v44, 2  ;;  %v411_v54 = vadd.f32 %v410_v42, %v409_v31  ;;  %v2317_v56 = vmul.f32 0.125, %v264_v40 }
  0xec   :  { %v391_v51 = vrot.slane %v390_v45, 1  ;;  %v400_v57 = vsel %vm229_vm1, %v348_v38, 0.0  ;;  %v585_v59 = vmul.f32 %v2003_v46, %v2315_v50  ;;  %v2321_v60 = vsub.s32 0, %v633_v47  ;;  %v2362_v46 = vpop.f32.mrf.mxu0 }
  0xed   :  { %v2005_v55 = vpop.eup %2004  ;;  %v539_v61 = vmax.f32 %v523_v48, 0.0  ;;  %v276_v62 = vadd.f32 %v275_v49, %v274_v44  ;;  %v285_v0 = vadd.f32 %v284_v53, %v283_v37  ;;  %v412_v1 = vrot.slane %v411_v54, 1 }
  0xee   :  { %v392_v58 = vadd.f32 %v391_v51, %v390_v45  ;;  %v401_v2 = vrot.slane %v400_v57, 4  ;;  %v506_v4 = vmul.f32 %v2317_v56, %v2317_v56  ;;  %v2328_v6 = vmul.f32 %v585_v59, %v2265_v7 }
  0xef   :  { %v639_v8 = vrot.slane %v585_v59, %v2321_v60  ;;  %v557_v9 = vadd.f32 1e-05, %v539_v61  ;;  %v277_v10 = vrot.slane %v276_v62, 1  ;;  %v413_v13 = vadd.f32 %v412_v1, %v411_v54 }
  0xf0   :  { %v2007_v63 = vpop.eup %2006  ;;  %v490_v3 = vmul.f32 0.125, %v392_v58  ;;  %v2336_v15 = vmul.f32 0.125, %v285_v0  ;;  %v402_v16 = vadd.f32 %v401_v2, %v400_v57  ;;  %v293_v7 = vsel %vm229_vm1, %v2325_v5, 0.0 }
  0xf1   :  { %v2339_v17 = vmul.f32 %v2007_v63, %v2315_v50  ;;  %v2344_v20 = vmul.f32 %v2005_v55, %v2315_v50  ;;  %v617_v27 = vsub.f32 %v2334_v12, %v2328_v6  ;;  %v2351_v28 = vmul.f32 %v2237_v22, %v639_v8 }
  0xf2   :  { %v522_v19 = vsub.f32 %v490_v3, %v506_v4  ;;  %v403_v21 = vrot.slane %v402_v16, 2  ;;  %2010 = vrsqrt.f32 %v557_v9  ;;  %v278_v29 = vadd.f32 %v277_v10, %v276_v62 }
  0xf3   :  { %v493_v31 = vmul.f32 0.125, %v413_v13  ;;  %v509_v32 = vmul.f32 %v2336_v15, %v2336_v15  ;;  %v294_v36 = vrot.slane %v293_v7, 4  ;;  %v603_v37 = vmul.f32 %v2339_v17, %v2277_v30 }
  0xf4   :  { %v404_v35 = vadd.f32 %v403_v21, %v402_v16  ;;  %v538_v38 = vmax.f32 %v522_v19, 0.0  ;;  %v351_v39 = vmul.f32 %v2325_v5, %v2325_v5  ;;  %v286_v40 = vsel %vm229_vm1, %v2346_v24, 0.0 }
  0xf5   :  { %v295_v44 = vadd.f32 %v294_v36, %v293_v7  ;;  %v287_v45 = vrot.slane %v286_v40, 4  ;;  %v647_v47 = vrot.slane %v2339_v17, %v2321_v60  ;;  %v2366_v48 = vmul.f32 0.125, %v278_v29 }
  0xf6   :  { %v405_v42 = vrot.slane %v404_v35, 1  ;;  %v421_v30 = vsel %vm229_vm1, %v351_v39, 0.0  ;;  %v350_v49 = vmul.f32 %v2346_v24, %v2346_v24  ;;  %v525_v51 = vsub.f32 %v493_v31, %v509_v32 }
  0xf7   :  { %v2009_v25 = vpop.eup %2008  ;;  %v296_v53 = vrot.slane %v295_v44, 2  ;;  %v422_v54 = vrot.slane %v421_v30, 4  ;;  %v288_v55 = vadd.f32 %v287_v45, %v286_v40  ;;  %v556_v57 = vadd.f32 1e-05, %v538_v38 }
  0xf8   :  { %v586_v22 = vmul.f32 %v2009_v25, %v2315_v50  ;;  %v406_v58 = vadd.f32 %v405_v42, %v404_v35  ;;  %v414_v59 = vsel %vm229_vm1, %v350_v49, 0.0  ;;  %v307_v61 = vsel %vm229_vm1, %v2362_v46, 0.0 }
  0xf9   :  { %v297_v63 = vadd.f32 %v296_v53, %v295_v44  ;;  %v423_v0 = vadd.f32 %v422_v54, %v421_v30  ;;  %v289_v1 = vrot.slane %v288_v55, 2  ;;  %v619_v2 = vsub.f32 %v2334_v12, %v603_v37 }
  0xfa   :  { %v602_v62 = vmul.f32 %v586_v22, %v2285_v43  ;;  %v508_v3 = vmul.f32 %v2366_v48, %v2366_v48  ;;  %v415_v4 = vrot.slane %v414_v59, 4  ;;  %v308_v6 = vrot.slane %v307_v61, 4 }
  0xfb   :  { %v298_v8 = vrot.slane %v297_v63, 1  ;;  %v424_v9 = vrot.slane %v423_v0, 2  ;;  %v290_v10 = vadd.f32 %v289_v1, %v288_v55  ;;  %v353_v13 = vmul.f32 %v2362_v46, %v2362_v46 }
  0xfc   :  { %2012 = vrsqrt.f32 %v556_v57  ;;  %v492_v16 = vmul.f32 0.125, %v406_v58  ;;  %v416_v17 = vadd.f32 %v415_v4, %v414_v59  ;;  %v309_v43 = vadd.f32 %v308_v6, %v307_v61 }
  0xfd   :  { %v618_v19 = vsub.f32 %v2334_v12, %v602_v62  ;;  %v299_v7 = vadd.f32 %v298_v8, %v297_v63  ;;  %v425_v21 = vadd.f32 %v424_v9, %v423_v0  ;;  %v291_v25 = vrot.slane %v290_v10, 1 }
  0xfe   :  { %v719_v29 = vrot.slane %v617_v27, %v2321_v60  ;;  %v643_v31 = vrot.slane %v586_v22, %v2321_v60  ;;  %v417_v32 = vrot.slane %v416_v17, 2  ;;  %v310_v35 = vrot.slane %v309_v43, 2 }
  0xff   :  { %v2011_v36 = vpop.eup %2010  ;;  %v541_v37 = vmax.f32 %v525_v51, 0.0  ;;  %v426_v38 = vrot.slane %v425_v21, 1  ;;  %v292_v39 = vadd.f32 %v291_v25, %v290_v10  ;;  %v435_v40 = vsel %vm229_vm1, %v353_v13, 0.0 }
 0x100   :  { %v727_v42 = vrot.slane %v619_v2, %v2321_v60  ;;  %v524_v44 = vsub.f32 %v492_v16, %v508_v3  ;;  %v418_v45 = vadd.f32 %v417_v32, %v416_v17  ;;  %v311_v30 = vadd.f32 %v310_v35, %v309_v43 }
 0x101   :  { %v699_v49 = vmul.f32 %v2250_v33, %v647_v47  ;;  %v723_v53 = vrot.slane %v618_v19, %v2321_v60  ;;  %v427_v27 = vadd.f32 %v426_v38, %v425_v21  ;;  %v2387_v54 = vmul.f32 0.125, %v299_v7  ;;  %v2397_v33 = vpop.f32.mrf.mxu0 }
 0x102   :  { %v419_v22 = vrot.slane %v418_v45, 1  ;;  %v2389_v55 = vmul.f32 0.125, %v292_v39  ;;  %v312_v51 = vrot.slane %v311_v30, 1  ;;  %v436_v57 = vrot.slane %v435_v40, 4 }
 0x103   :  { %v2392_v58 = vadd.f32 %v719_v29, %v2351_v28  ;;  %v635_v59 = vrot.slane %v2344_v20, %v2321_v60  ;;  %v698_v61 = vmul.f32 %v643_v31, %v2257_v41  ;;  %v559_v62 = vadd.f32 1e-05, %v541_v37  ;;  %v2416_v16 = vpop.f32.mrf.mxu0 }
 0x104   :  { %v2399_v47 = vadd.f32 %v727_v42, %v699_v49  ;;  %v540_v63 = vmax.f32 %v524_v44, 0.0  ;;  %v420_v0 = vadd.f32 %v419_v22, %v418_v45  ;;  %v510_v1 = vmul.f32 %v2389_v55, %v2389_v55 }
 0x105   :  { %v2403_v2 = vadd.f32 %v723_v53, %v698_v61  ;;  %v495_v3 = vmul.f32 0.125, %v427_v27  ;;  %v511_v28 = vmul.f32 %v2387_v54, %v2387_v54  ;;  %v589_v4 = vmul.f32 %v2011_v36, %v2315_v50  ;;  %v2435_v44 = vpop.f32.mrf.mxu0 }
 0x106   :  { %v494_v6 = vmul.f32 0.125, %v420_v0  ;;  %v313_v41 = vadd.f32 %v312_v51, %v311_v30  ;;  %v437_v8 = vadd.f32 %v436_v57, %v435_v40  ;;  %v2409_v9 = vmul.f32 0.01, %v2392_v58 }
 0x107   :  { %v2412_v10 = vmul.f32 %v635_v59, %v2243_v26  ;;  %2014 = vrsqrt.f32 %v559_v62  ;;  %v300_v13 = vsel %vm229_vm1, %v2397_v33, 0.0  ;;  %v2419_v17 = vmul.f32 0.01, %v2399_v47 }
 0x108   :  { %v558_v43 = vadd.f32 1e-05, %v540_v63  ;;  %v526_v19 = vsub.f32 %v494_v6, %v510_v1  ;;  %v438_v7 = vrot.slane %v437_v8, 2  ;;  %v2422_v25 = vmul.f32 0.01, %v2403_v2 }
 0x109   :  { %v2013_v21 = vpop.eup %2012  ;;  %v527_v29 = vsub.f32 %v495_v3, %v511_v28  ;;  %v301_v31 = vrot.slane %v300_v13, 4  ;;  %v352_v26 = vmul.f32 %v2397_v33, %v2397_v33  ;;  %v2427_v32 = vmul.f32 %v589_v4, %v2304_v23 }
 0x10a   :  { %v439_v35 = vadd.f32 %v438_v7, %v437_v8  ;;  %v2429_v36 = vmul.f32 0.125, %v313_v41  ;;  %v321_v37 = vsel %vm229_vm1, %v2416_v16, 0.0  ;;  %v655_v38 = vrot.slane %v589_v4, %v2321_v60 }
 0x10b   :  { %v542_v39 = vmax.f32 %v526_v19, 0.0  ;;  %v302_v40 = vadd.f32 %v301_v31, %v300_v13  ;;  %v428_v42 = vsel %vm229_vm1, %v352_v26, 0.0  ;;  %v2438_v45 = vmul.f32 %v2013_v21, %v2315_v50 }
 0x10c   :  { %2016 = vrsqrt.f32 %v558_v43  ;;  %v440_v23 = vrot.slane %v439_v35, 1  ;;  %v429_v30 = vrot.slane %v428_v42, 4  ;;  %v543_v49 = vmax.f32 %v527_v29, 0.0 }
 0x10d   :  { %v303_v53 = vrot.slane %v302_v40, 2  ;;  %v322_v27 = vrot.slane %v321_v37, 4  ;;  %v355_v22 = vmul.f32 %v2416_v16, %v2416_v16  ;;  %v513_v57 = vmul.f32 %v2429_v36, %v2429_v36 }
 0x10e   :  { %v441_v51 = vadd.f32 %v440_v23, %v439_v35  ;;  %v430_v59 = vadd.f32 %v429_v30, %v428_v42  ;;  %v314_v61 = vsel %vm229_vm1, %v2435_v44, 0.0  ;;  %v560_v62 = vadd.f32 1e-05, %v542_v39 }
 0x10f   :  { %v304_v63 = vadd.f32 %v303_v53, %v302_v40  ;;  %v323_v0 = vadd.f32 %v322_v27, %v321_v37  ;;  %v449_v1 = vsel %vm229_vm1, %v355_v22, 0.0  ;;  %v315_v6 = vrot.slane %v314_v61, 4  ;;  %v2456_v22 = vpop.f32.mrf.mxu0 }
 0x110   :  { %v497_v3 = vmul.f32 0.125, %v441_v51  ;;  %v431_v28 = vrot.slane %v430_v59, 2  ;;  %v450_v4 = vrot.slane %v449_v1, 4  ;;  %v621_v41 = vsub.f32 %v2334_v12, %v2427_v32 }
 0x111   :  { %v561_v8 = vadd.f32 1e-05, %v543_v49  ;;  %v305_v13 = vrot.slane %v304_v63, 1  ;;  %v324_v43 = vrot.slane %v323_v0, 2  ;;  %v316_v29 = vadd.f32 %v315_v6, %v314_v61 }
 0x112   :  { %v529_v19 = vsub.f32 %v497_v3, %v513_v57  ;;  %v432_v7 = vadd.f32 %v431_v28, %v430_v59  ;;  %v451_v21 = vadd.f32 %v450_v4, %v449_v1  ;;  %v701_v31 = vmul.f32 %v2267_v14, %v655_v38 }
 0x113   :  { %v604_v26 = vmul.f32 %v2438_v45, %v2317_v56  ;;  %v306_v35 = vadd.f32 %v305_v13, %v304_v63  ;;  %v325_v37 = vadd.f32 %v324_v43, %v323_v0  ;;  %2018 = vrsqrt.f32 %v560_v62 }
 0x114   :  { %v2015_v39 = vpop.eup %2014  ;;  %v433_v40 = vrot.slane %v432_v7, 1  ;;  %v452_v42 = vrot.slane %v451_v21, 2  ;;  %v317_v23 = vrot.slane %v316_v29, 2  ;;  %2020 = vrsqrt.f32 %v561_v8 }
 0x115   :  { %v2452_v32 = vmul.f32 0.125, %v306_v35  ;;  %v326_v30 = vrot.slane %v325_v37, 1  ;;  %v354_v49 = vmul.f32 %v2435_v44, %v2435_v44  ;;  %v545_v53 = vmax.f32 %v529_v19, 0.0 }
 0x116   :  { %v434_v27 = vadd.f32 %v433_v40, %v432_v7  ;;  %v453_v14 = vadd.f32 %v452_v42, %v451_v21  ;;  %v318_v38 = vadd.f32 %v317_v23, %v316_v29  ;;  %v591_v56 = vmul.f32 %v2015_v39, %v2315_v50 }
 0x117   :  { %v512_v51 = vmul.f32 %v2452_v32, %v2452_v32  ;;  %v327_v57 = vadd.f32 %v326_v30, %v325_v37  ;;  %v442_v59 = vsel %vm229_vm1, %v354_v49, 0.0  ;;  %v620_v61 = vsub.f32 %v2334_v12, %v604_v26 }
 0x118   :  { %v496_v62 = vmul.f32 0.125, %v434_v27  ;;  %v454_v63 = vrot.slane %v453_v14, 1  ;;  %v319_v0 = vrot.slane %v318_v38, 1  ;;  %v651_v3 = vrot.slane %v2438_v45, %v2321_v60 }
 0x119   :  { %v2017_v1 = vpop.eup %2016  ;;  %v2465_v28 = vmul.f32 0.125, %v327_v57  ;;  %v443_v4 = vrot.slane %v442_v59, 4  ;;  %v335_v6 = vsel %vm229_vm1, %v2456_v22, 0.0  ;;  %v563_v8 = vadd.f32 1e-05, %v545_v53 }
 0x11a   :  { %v528_v13 = vsub.f32 %v496_v62, %v512_v51  ;;  %v455_v43 = vadd.f32 %v454_v63, %v453_v14  ;;  %v320_v19 = vadd.f32 %v319_v0, %v318_v38  ;;  %v735_v7 = vrot.slane %v621_v41, %v2321_v60 }
 0x11b   :  { %v515_v21 = vmul.f32 %v2465_v28, %v2465_v28  ;;  %v444_v29 = vadd.f32 %v443_v4, %v442_v59  ;;  %v336_v26 = vrot.slane %v335_v6, 4  ;;  %v731_v35 = vrot.slane %v620_v61, %v2321_v60  ;;  %v2489_v61 = vpop.f32.mrf.mxu0 }
 0x11c   :  { %v607_v45 = vmul.f32 %v591_v56, %v2336_v15  ;;  %v663_v37 = vrot.slane %v591_v56, %v2321_v60  ;;  %v544_v39 = vmax.f32 %v528_v13, 0.0  ;;  %v499_v40 = vmul.f32 0.125, %v455_v43 }
 0x11d   :  { %v445_v42 = vrot.slane %v444_v29, 2  ;;  %v337_v23 = vadd.f32 %v336_v26, %v335_v6  ;;  %v357_v30 = vmul.f32 %v2456_v22, %v2456_v22  ;;  %v700_v41 = vmul.f32 %v651_v3, %v2279_v34 }
 0x11e   :  { %v590_v49 = vmul.f32 %v2017_v1, %v2315_v50  ;;  %2022 = vrsqrt.f32 %v563_v8  ;;  %v2479_v53 = vmul.f32 0.125, %v320_v19  ;;  %v2481_v27 = vadd.f32 %v735_v7, %v701_v31 }
 0x11f   :  { %v562_v14 = vadd.f32 1e-05, %v544_v39  ;;  %v531_v15 = vsub.f32 %v499_v40, %v515_v21  ;;  %v446_v38 = vadd.f32 %v445_v42, %v444_v29  ;;  %v2483_v56 = vadd.f32 %v731_v35, %v700_v41 }
 0x120   :  { %v623_v51 = vsub.f32 %v2334_v12, %v607_v45  ;;  %v2487_v57 = vmul.f32 %v2290_v52, %v663_v37  ;;  %v338_v59 = vrot.slane %v337_v23, 2  ;;  %v2019_v34 = vpop.eup %2018  ;;  %v463_v31 = vsel %vm229_vm1, %v357_v30, 0.0 }
 0x121   :  { %2024 = vrsqrt.f32 %v562_v14  ;;  %v547_v62 = vmax.f32 %v531_v15, 0.0  ;;  %v447_v63 = vrot.slane %v446_v38, 1  ;;  %v2021_v0 = vpop.eup %2020  ;;  %v606_v1 = vmul.f32 %v590_v49, %v2366_v48 }
 0x122   :  { %v514_v3 = vmul.f32 %v2479_v53, %v2479_v53  ;;  %v339_v4 = vadd.f32 %v338_v59, %v337_v23  ;;  %v464_v6 = vrot.slane %v463_v31, 4  ;;  %v328_v13 = vsel %vm229_vm1, %v2489_v61, 0.0 }
 0x123   :  { %v565_v8 = vadd.f32 1e-05, %v547_v62  ;;  %v448_v52 = vadd.f32 %v447_v63, %v446_v38  ;;  %v356_v43 = vmul.f32 %v2489_v61, %v2489_v61  ;;  %v659_v19 = vrot.slane %v590_v49, %v2321_v60 }
 0x124   :  { %v592_v7 = vmul.f32 %v2019_v34, %v2315_v50  ;;  %v340_v21 = vrot.slane %v339_v4, 1  ;;  %v465_v29 = vadd.f32 %v464_v6, %v463_v31  ;;  %v329_v26 = vrot.slane %v328_v13, 4 }
 0x125   :  { %2026 = vrsqrt.f32 %v565_v8  ;;  %v498_v48 = vmul.f32 0.125, %v448_v52  ;;  %v456_v35 = vsel %vm229_vm1, %v356_v43, 0.0  ;;  %v622_v45 = vsub.f32 %v2334_v12, %v606_v1 }
 0x126   :  { %v2504_v37 = vmul.f32 %v2021_v0, %v2315_v50  ;;  %v341_v39 = vadd.f32 %v340_v21, %v339_v4  ;;  %v466_v40 = vrot.slane %v465_v29, 2  ;;  %v330_v23 = vadd.f32 %v329_v26, %v328_v13 }
 0x127   :  { %v530_v42 = vsub.f32 %v498_v48, %v514_v3  ;;  %v457_v30 = vrot.slane %v456_v35, 4  ;;  %v600_v41 = vmul.f32 %v2344_v20, %v2271_v18  ;;  %v743_v49 = vrot.slane %v623_v51, %v2321_v60 }
 0x128   :  { %v608_v14 = vmul.f32 %v592_v7, %v2389_v55  ;;  %v467_v15 = vadd.f32 %v466_v40, %v465_v29  ;;  %v2510_v38 = vmul.f32 0.125, %v341_v39  ;;  %v331_v34 = vrot.slane %v330_v23, 2 }
 0x129   :  { %v546_v59 = vmax.f32 %v530_v42, 0.0  ;;  %v458_v62 = vadd.f32 %v457_v30, %v456_v35  ;;  %v616_v63 = vsub.f32 %v2334_v12, %v600_v41  ;;  %v702_v31 = vmul.f32 %v659_v19, %v2301_v11 }
 0x12a   :  { %v739_v0 = vrot.slane %v622_v45, %v2321_v60  ;;  %v609_v1 = vmul.f32 %v2504_v37, %v2387_v54  ;;  %v468_v18 = vrot.slane %v467_v15, 1  ;;  %v332_v3 = vadd.f32 %v331_v34, %v330_v23 }
 0x12b   :  { %v2023_v20 = vpop.eup %2022  ;;  %v564_v51 = vadd.f32 1e-05, %v546_v59  ;;  %v459_v55 = vrot.slane %v458_v62, 2  ;;  %v715_v4 = vrot.slane %v616_v63, %v2321_v60  ;;  %v624_v6 = vsub.f32 %v2334_v12, %v608_v14 }
 0x12c   :  { %v667_v8 = vrot.slane %v592_v7, %v2321_v60  ;;  %v469_v52 = vadd.f32 %v468_v18, %v467_v15  ;;  %v517_v11 = vmul.f32 %v2510_v38, %v2510_v38  ;;  %v333_v13 = vrot.slane %v332_v3, 1 }
 0x12d   :  { %2028 = vrsqrt.f32 %v564_v51  ;;  %v460_v43 = vadd.f32 %v459_v55, %v458_v62  ;;  %v776_v54 = vadd.f32 %v715_v4, %v2412_v10  ;;  %v796_v21 = vmul.f32 0.01, %v2483_v56 }
 0x12e   :  { %v2025_v19 = vpop.eup %2024  ;;  %v2524_v29 = vadd.f32 %v739_v0, %v702_v31  ;;  %v595_v48 = vmul.f32 %v2023_v20, %v2315_v50  ;;  %v501_v26 = vmul.f32 0.125, %v469_v52  ;;  %v334_v7 = vadd.f32 %v333_v13, %v332_v3 }
 0x12f   :  { %v594_v35 = vmul.f32 %v2025_v19, %v2315_v50  ;;  %v461_v45 = vrot.slane %v460_v43, 1  ;;  %v792_v39 = vmul.f32 0.01, %v776_v54  ;;  %v625_v40 = vsub.f32 %v2334_v12, %v609_v1 }
 0x130   :  { %v671_v42 = vrot.slane %v2504_v37, %v2321_v60  ;;  %v704_v10 = vmul.f32 %v667_v8, %v2346_v24  ;;  %v533_v23 = vsub.f32 %v501_v26, %v517_v11  ;;  %v747_v30 = vrot.slane %v624_v6, %v2321_v60 }
 0x131   :  { %v610_v41 = vmul.f32 %v594_v35, %v2452_v32  ;;  %v462_v14 = vadd.f32 %v461_v45, %v460_v43  ;;  %v2534_v15 = vmul.f32 0.125, %v334_v7  ;;  %v611_v34 = vmul.f32 %v595_v48, %v2429_v36 }
 0x132   :  { %v2027_v59 = vpop.eup %2026  ;;  %v549_v62 = vmax.f32 %v533_v23, 0.0  ;;  %v808_v63 = vmax.f32 %v776_v54, %v792_v39  ;;  %v810_v31 = vmax.f32 %v2403_v2, %v2422_v25  ;;  %v809_v1 = vmax.f32 %v2392_v58, %v2409_v9 }
 0x133   :  { %v626_v37 = vsub.f32 %v2334_v12, %v610_v41  ;;  %v597_v24 = vmul.f32 %v2027_v59, %v2315_v50  ;;  %v500_v0 = vmul.f32 0.125, %v462_v14  ;;  %v797_v32 = vmul.f32 0.01, %v2481_v27 }
 0x134   :  { %v675_v18 = vrot.slane %v594_v35, %v2321_v60  ;;  %v567_v20 = vadd.f32 1e-05, %v549_v62  ;;  %v516_v36 = vmul.f32 %v2534_v15, %v2534_v15  ;;  %1978 = vmatprep.mubr.msk.f32.mxu1 %vm229_vm1, %v808_v63  ;;  %v783_v2 = vadd.f32 %v743_v49, %v2487_v57 }
 0x135   :  { %v798_v25 = vmul.f32 0.01, %v2524_v29  ;;  %v751_v51 = vrot.slane %v625_v40, %v2321_v60  ;;  %v784_v3 = vadd.f32 %v747_v30, %v704_v10  ;;  %1979 = vmatmul.mubr.msk.f32.vlgmr.msra.gmra.mxu1 %vm229_vm1, %v809_v1  ;;  %v755_v58 = vrot.slane %v626_v37, %v2321_v60 }
 0x136   :  { %2030 = vrsqrt.f32 %v567_v20  ;;  %v532_v9 = vsub.f32 %v500_v0, %v516_v36  ;;  %1981 = vmatprep.mubr.msk.f32.mxu1 %vm229_vm1, %v810_v31  ;;  %v812_v55 = vmax.f32 %v2483_v56, %v796_v21  ;;  %v705_v4 = vmul.f32 %v2325_v5, %v671_v42 }
 0x137   :  { %v627_v6 = vsub.f32 %v2334_v12, %v611_v34  ;;  %v613_v57 = vmul.f32 %v597_v24, %v2465_v28  ;;  %v811_v49 = vmax.f32 %v2399_v47, %v2419_v17  ;;  %v706_v8 = vmul.f32 %v675_v18, %v2397_v33 }
 0x138   :  { %v548_v52 = vmax.f32 %v532_v9, 0.0  ;;  %v799_v11 = vmul.f32 0.01, %v783_v2  ;;  %v785_v13 = vadd.f32 %v751_v51, %v705_v4  ;;  %v679_v43 = vrot.slane %v595_v48, %v2321_v60 }
 0x139   :  { %1982 = vmatmul.mubr.msk.f32.gmra.mxu1 %vm229_vm1, %v811_v49  ;;  %v800_v56 = vmul.f32 0.01, %v784_v3  ;;  %v786_v19 = vadd.f32 %v755_v58, %v706_v8  ;;  %v814_v28 = vmax.f32 %v2524_v29, %v798_v25  ;;  %v759_v21 = vrot.slane %v627_v6, %v2321_v60 }
 0x13a   :  { %v2029_v54 = vpop.eup %2028  ;;  %v566_v5 = vadd.f32 1e-05, %v548_v52  ;;  %1984 = vmatprep.mubr.msk.f32.mxu1 %vm229_vm1, %v812_v55  ;;  %v629_v47 = vsub.f32 %v2334_v12, %v613_v57  ;;  %v813_v17 = vmax.f32 %v2481_v27, %v797_v32  ;;  %v707_v48 = vmul.f32 %v2362_v46, %v679_v43 }
 0x13b   :  { %v596_v33 = vmul.f32 %v2029_v54, %v2315_v50  ;;  %v687_v26 = vrot.slane %v597_v24, %v2321_v60  ;;  %v801_v29 = vmul.f32 0.01, %v785_v13  ;;  %v802_v45 = vmul.f32 0.01, %v786_v19 }
 0x13c   :  { %2032 = vrsqrt.f32 %v566_v5  ;;  %v816_v39 = vmax.f32 %v784_v3, %v800_v56  ;;  %v787_v40 = vadd.f32 %v759_v21, %v707_v48  ;;  %v767_v42 = vrot.slane %v629_v47, %v2321_v60 }
 0x13d   :  { %v612_v35 = vmul.f32 %v596_v33, %v2479_v53  ;;  %v683_v7 = vrot.slane %v596_v33, %v2321_v60  ;;  %1985 = vmatmul.mubr.msk.f32.gmra.mxu1 %vm229_vm1, %v813_v17  ;;  %v815_v10 = vmax.f32 %v783_v2, %v799_v11  ;;  %v709_v46 = vmul.f32 %v2416_v16, %v687_v26 }
 0x13e   :  { %1987 = vmatprep.mubr.msk.f32.mxu1 %vm229_vm1, %v814_v28  ;;  %v818_v30 = vmax.f32 %v786_v19, %v802_v45  ;;  %v803_v14 = vmul.f32 0.01, %v787_v40  ;;  %v817_v62 = vmax.f32 %v785_v13, %v801_v29 }
 0x13f   :  { %v628_v27 = vsub.f32 %v2334_v12, %v612_v35  ;;  %v708_v23 = vmul.f32 %v683_v7, %v2435_v44  ;;  %v789_v59 = vadd.f32 %v767_v42, %v709_v46 }
 0x140   :  { %v819_v37 = vmax.f32 %v787_v40, %v803_v14 }
 0x141   :  { %v763_v53 = vrot.slane %v628_v27, %v2321_v60  ;;  %1988 = vmatmul.mubr.msk.f32.gmra.mxu1 %vm229_vm1, %v815_v10  ;;  %v805_v44 = vmul.f32 0.01, %v789_v59 }
 0x142   :  { %1990 = vmatprep.mubr.msk.f32.mxu1 %vm229_vm1, %v816_v39 }
 0x143   :  { %v2031_v41 = vpop.eup %2030  ;;  %v788_v34 = vadd.f32 %v763_v53, %v708_v23  ;;  %v821_v36 = vmax.f32 %v789_v59, %v805_v44 }
 0x144   :  { %v599_v63 = vmul.f32 %v2031_v41, %v2315_v50 }
 0x145   :  { %v804_v31 = vmul.f32 0.01, %v788_v34  ;;  %1991 = vmatmul.mubr.msk.f32.gmra.mxu1 %vm229_vm1, %v817_v62 }
 0x146   :  { %v615_v16 = vmul.f32 %v599_v63, %v2510_v38  ;;  %1993 = vmatprep.mubr.msk.f32.mxu1 %vm229_vm1, %v818_v30  ;;  %v695_v32 = vrot.slane %v599_v63, %v2321_v60 }
 0x147   :  { %v820_v24 = vmax.f32 %v788_v34, %v804_v31 }
 0x148   :  { %v631_v0 = vsub.f32 %v2334_v12, %v615_v16  ;;  %v711_v25 = vmul.f32 %v2456_v22, %v695_v32 }
 0x149   :  { %v2033_v1 = vpop.eup %2032  ;;  %1994 = vmatmul.mubr.msk.f32.gmra.mxu1 %vm229_vm1, %v819_v37 }
 0x14a   :  { %v598_v18 = vmul.f32 %v2033_v1, %v2315_v50  ;;  %1996 = vmatprep.mubr.msk.f32.mxu1 %vm229_vm1, %v820_v24  ;;  %v775_v20 = vrot.slane %v631_v0, %v2321_v60 }
 0x14c   :  { %v614_v38 = vmul.f32 %v598_v18, %v2534_v15  ;;  %v691_v2 = vrot.slane %v598_v18, %v2321_v60  ;;  %v791_v3 = vadd.f32 %v775_v20, %v711_v25 }
 0x14d   :  { %1997 = vmatmul.mubr.msk.f32.gmra.mxu1 %vm229_vm1, %v821_v36 }
 0x14e   :  { %v630_v51 = vsub.f32 %v2334_v12, %v614_v38  ;;  %v710_v58 = vmul.f32 %v691_v2, %v2489_v61  ;;  %v807_v55 = vmul.f32 0.01, %v791_v3 }
 0x150   :  { %v771_v50 = vrot.slane %v630_v51, %v2321_v60  ;;  %v823_v57 = vmax.f32 %v791_v3, %v807_v55 }
 0x152   :  { %v790_v9 = vadd.f32 %v771_v50, %v710_v58 }
 0x154   :  { %v806_v4 = vmul.f32 0.01, %v790_v9 }
 0x156   :  { %v822_v6 = vmax.f32 %v790_v9, %v806_v4 }
 0x158   :  { %1999 = vmatprep.mubr.msk.f32.mxu1 %vm229_vm1, %v822_v6 }
 0x159   :  { %2000 = vmatmul.mubr.msk.f32.gmra.mxu1 %vm229_vm1, %v823_v57 }
 0x1f5   :  { %v2601_v15 = vpop.f32.mrf.mxu1 }
 0x1f6   :  { %v1028_v22 = vsel %vm229_vm1, %v2601_v15, 0.0  ;;  %v1134_v12 = vmul.f32 %v2601_v15, %v2601_v15 }
 0x1f7   :  { %v1029_v61 = vrot.slane %v1028_v22, 4  ;;  %v2607_v49 = vpop.f32.mrf.mxu1 }
 0x1f8   :  { %v1156_v8 = vsel %vm229_vm1, %v1134_v12, 0.0  ;;  %v1021_v52 = vsel %vm229_vm1, %v2607_v49, 0.0  ;;  %v1133_v11 = vmul.f32 %v2607_v49, %v2607_v49 }
 0x1f9   :  { %v1030_v13 = vadd.f32 %v1029_v61, %v1028_v22  ;;  %v1157_v43 = vrot.slane %v1156_v8, 4  ;;  %v1022_v54 = vrot.slane %v1021_v52, 4  ;;  %v2614_v56 = vpop.f32.mrf.mxu1 }
 0x1fa   :  { %v1149_v19 = vsel %vm229_vm1, %v1133_v11, 0.0  ;;  %v1042_v5 = vsel %vm229_vm1, %v2614_v56, 0.0  ;;  %v1136_v28 = vmul.f32 %v2614_v56, %v2614_v56 }
 0x1fb   :  { %v1031_v21 = vrot.slane %v1030_v13, 2  ;;  %v1158_v47 = vadd.f32 %v1157_v43, %v1156_v8  ;;  %v1023_v33 = vadd.f32 %v1022_v54, %v1021_v52  ;;  %v1150_v17 = vrot.slane %v1149_v19, 4  ;;  %v2621_v48 = vpop.f32.mrf.mxu1 }
 0x1fc   :  { %v1043_v26 = vrot.slane %v1042_v5, 4  ;;  %v1170_v35 = vsel %vm229_vm1, %v1136_v28, 0.0  ;;  %v1035_v7 = vsel %vm229_vm1, %v2621_v48, 0.0  ;;  %v1135_v29 = vmul.f32 %v2621_v48, %v2621_v48 }
 0x1fd   :  { %v1032_v45 = vadd.f32 %v1031_v21, %v1030_v13  ;;  %v1159_v39 = vrot.slane %v1158_v47, 2  ;;  %v1024_v40 = vrot.slane %v1023_v33, 2  ;;  %v1151_v42 = vadd.f32 %v1150_v17, %v1149_v19  ;;  %v2631_v58 = vpop.f32.mrf.mxu1 }
 0x1fe   :  { %v1044_v27 = vadd.f32 %v1043_v26, %v1042_v5  ;;  %v1171_v10 = vrot.slane %v1170_v35, 4  ;;  %v1036_v46 = vrot.slane %v1035_v7, 4  ;;  %v1163_v23 = vsel %vm229_vm1, %v1135_v29, 0.0 }
 0x1ff   :  { %v1033_v53 = vrot.slane %v1032_v45, 1  ;;  %v1160_v30 = vadd.f32 %v1159_v39, %v1158_v47  ;;  %v1025_v41 = vadd.f32 %v1024_v40, %v1023_v33  ;;  %v1152_v14 = vrot.slane %v1151_v42, 2  ;;  %v2643_v5 = vpop.f32.mrf.mxu1 }
 0x200   :  { %v1045_v59 = vrot.slane %v1044_v27, 2  ;;  %v1172_v34 = vadd.f32 %v1171_v10, %v1170_v35  ;;  %v1037_v62 = vadd.f32 %v1036_v46, %v1035_v7  ;;  %v1164_v63 = vrot.slane %v1163_v23, 4 }
 0x201   :  { %v1034_v31 = vadd.f32 %v1033_v53, %v1032_v45  ;;  %v1161_v16 = vrot.slane %v1160_v30, 1  ;;  %v1026_v44 = vrot.slane %v1025_v41, 1  ;;  %v1153_v37 = vadd.f32 %v1152_v14, %v1151_v42 }
 0x202   :  { %v1046_v24 = vadd.f32 %v1045_v59, %v1044_v27  ;;  %v1173_v0 = vrot.slane %v1172_v34, 2  ;;  %v1038_v1 = vrot.slane %v1037_v62, 2  ;;  %v1165_v32 = vadd.f32 %v1164_v63, %v1163_v23  ;;  %v2654_v23 = vpop.f32.mrf.mxu1 }
 0x203   :  { %v1162_v18 = vadd.f32 %v1161_v16, %v1160_v30  ;;  %v2629_v20 = vmul.f32 0.125, %v1034_v31  ;;  %v1027_v36 = vadd.f32 %v1026_v44, %v1025_v41  ;;  %v1154_v38 = vrot.slane %v1153_v37, 1 }
 0x204   :  { %v1047_v2 = vrot.slane %v1046_v24, 1  ;;  %v1174_v25 = vadd.f32 %v1173_v0, %v1172_v34  ;;  %v1039_v51 = vadd.f32 %v1038_v1, %v1037_v62  ;;  %v1166_v3 = vrot.slane %v1165_v32, 2 }
 0x205   :  { %v1278_v50 = vmul.f32 0.125, %v1162_v18  ;;  %v1294_v9 = vmul.f32 %v2629_v20, %v2629_v20  ;;  %v1155_v55 = vadd.f32 %v1154_v38, %v1153_v37  ;;  %v2635_v4 = vmul.f32 0.125, %v1027_v36 }
 0x206   :  { %v1048_v6 = vadd.f32 %v1047_v2, %v1046_v24  ;;  %v1175_v57 = vrot.slane %v1174_v25, 1  ;;  %v1040_v22 = vrot.slane %v1039_v51, 1  ;;  %v1167_v12 = vadd.f32 %v1166_v3, %v1165_v32 }
 0x207   :  { %v1310_v61 = vsub.f32 %v1278_v50, %v1294_v9  ;;  %v1277_v8 = vmul.f32 0.125, %v1155_v55  ;;  %v1293_v52 = vmul.f32 %v2635_v4, %v2635_v4  ;;  %v1056_v11 = vsel %vm229_vm1, %v2631_v58, 0.0 }
 0x208   :  { %v1176_v13 = vadd.f32 %v1175_v57, %v1174_v25  ;;  %v2641_v43 = vmul.f32 0.125, %v1048_v6  ;;  %v1041_v54 = vadd.f32 %v1040_v22, %v1039_v51  ;;  %v1168_v19 = vrot.slane %v1167_v12, 1  ;;  %v2665_v51 = vpop.f32.mrf.mxu1 }
 0x209   :  { %v1326_v28 = vmax.f32 %v1310_v61, 0.0  ;;  %v1309_v21 = vsub.f32 %v1277_v8, %v1293_v52  ;;  %v1057_v47 = vrot.slane %v1056_v11, 4  ;;  %v1138_v33 = vmul.f32 %v2631_v58, %v2631_v58 }
 0x20a   :  { %v1280_v17 = vmul.f32 0.125, %v1176_v13  ;;  %v1296_v26 = vmul.f32 %v2641_v43, %v2641_v43  ;;  %v1169_v35 = vadd.f32 %v1168_v19, %v1167_v12  ;;  %v2649_v7 = vmul.f32 0.125, %v1041_v54 }
 0x20b   :  { %v1344_v29 = vadd.f32 1e-05, %v1326_v28  ;;  %v1325_v45 = vmax.f32 %v1309_v21, 0.0  ;;  %v1058_v39 = vadd.f32 %v1057_v47, %v1056_v11  ;;  %v1184_v40 = vsel %vm229_vm1, %v1138_v33, 0.0  ;;  %v2672_v28 = vpop.f32.mrf.mxu1 }
 0x20c   :  { %v1312_v42 = vsub.f32 %v1280_v17, %v1296_v26  ;;  %v1279_v27 = vmul.f32 0.125, %v1169_v35  ;;  %v1295_v10 = vmul.f32 %v2649_v7, %v2649_v7  ;;  %v1185_v46 = vrot.slane %v1184_v40, 4  ;;  %v2681_v26 = vld [vmem:[%s3068_s3 + $0x2] sm:$0x1] }
 0x20d   :  { %2034 = vrsqrt.f32 %v1344_v29  ;;  %v1343_v53 = vadd.f32 1e-05, %v1325_v45  ;;  %v1059_v30 = vrot.slane %v1058_v39, 2  ;;  %v1049_v41 = vsel %vm229_vm1, %v2643_v5, 0.0 }
 0x20e   :  { %v1328_v14 = vmax.f32 %v1312_v42, 0.0  ;;  %v1311_v59 = vsub.f32 %v1279_v27, %v1295_v10  ;;  %v1186_v34 = vadd.f32 %v1185_v46, %v1184_v40  ;;  %v1050_v62 = vrot.slane %v1049_v41, 4 }
 0x20f   :  { %2036 = vrsqrt.f32 %v1343_v53  ;;  %v1060_v63 = vadd.f32 %v1059_v30, %v1058_v39  ;;  %v1137_v31 = vmul.f32 %v2643_v5, %v2643_v5  ;;  %v1070_v16 = vsel %vm229_vm1, %v2654_v23, 0.0 }
 0x210   :  { %v1346_v44 = vadd.f32 1e-05, %v1328_v14  ;;  %v1327_v37 = vmax.f32 %v1311_v59, 0.0  ;;  %v1187_v24 = vrot.slane %v1186_v34, 2  ;;  %v1051_v0 = vadd.f32 %v1050_v62, %v1049_v41 }
 0x211   :  { %v1061_v1 = vrot.slane %v1060_v63, 1  ;;  %v1177_v32 = vsel %vm229_vm1, %v1137_v31, 0.0  ;;  %v1071_v18 = vrot.slane %v1070_v16, 4  ;;  %v1140_v36 = vmul.f32 %v2654_v23, %v2654_v23 }
 0x212   :  { %2038 = vrsqrt.f32 %v1346_v44  ;;  %v1345_v38 = vadd.f32 1e-05, %v1327_v37  ;;  %v1188_v2 = vadd.f32 %v1187_v24, %v1186_v34  ;;  %v1052_v25 = vrot.slane %v1051_v0, 2 }
 0x213   :  { %v1062_v3 = vadd.f32 %v1061_v1, %v1060_v63  ;;  %v1178_v50 = vrot.slane %v1177_v32, 4  ;;  %v1072_v9 = vadd.f32 %v1071_v18, %v1070_v16  ;;  %v1198_v55 = vsel %vm229_vm1, %v1140_v36, 0.0  ;;  %v2694_v16 = vld [vmem:[%s3068_s3 + $0x3] sm:$0x1] }
 0x214   :  { %2040 = vrsqrt.f32 %v1345_v38  ;;  %v1189_v6 = vrot.slane %v1188_v2, 1  ;;  %v1053_v57 = vadd.f32 %v1052_v25, %v1051_v0  ;;  %v1199_v22 = vrot.slane %v1198_v55, 4 }
 0x215   :  { %v2668_v12 = vmul.f32 0.125, %v1062_v3  ;;  %v1179_v61 = vadd.f32 %v1178_v50, %v1177_v32  ;;  %v1073_v8 = vrot.slane %v1072_v9, 2  ;;  %v1063_v52 = vsel %vm229_vm1, %v2665_v51, 0.0 }
 0x216   :  { %v1190_v11 = vadd.f32 %v1189_v6, %v1188_v2  ;;  %v1054_v13 = vrot.slane %v1053_v57, 1  ;;  %v1200_v54 = vadd.f32 %v1199_v22, %v1198_v55  ;;  %v1064_v19 = vrot.slane %v1063_v52, 4 }
 0x217   :  { %v1298_v21 = vmul.f32 %v2668_v12, %v2668_v12  ;;  %v1180_v47 = vrot.slane %v1179_v61, 2  ;;  %v1074_v33 = vadd.f32 %v1073_v8, %v1072_v9  ;;  %v1139_v17 = vmul.f32 %v2665_v51, %v2665_v51 }
 0x218   :  { %v1282_v35 = vmul.f32 0.125, %v1190_v11  ;;  %v1055_v29 = vadd.f32 %v1054_v13, %v1053_v57  ;;  %v1201_v45 = vrot.slane %v1200_v54, 2  ;;  %v1065_v39 = vadd.f32 %v1064_v19, %v1063_v52 }
 0x219   :  { %v1181_v40 = vadd.f32 %v1180_v47, %v1179_v61  ;;  %v1075_v42 = vrot.slane %v1074_v33, 1  ;;  %v1191_v27 = vsel %vm229_vm1, %v1139_v17, 0.0  ;;  %v2686_v10 = vsel %vm229_vm1, %v2672_v28, 0.0 }
 0x21a   :  { %v2035_v46 = vpop.eup %2034  ;;  %v1314_v53 = vsub.f32 %v1282_v35, %v1298_v21  ;;  %v2688_v30 = vmul.f32 0.125, %v1055_v29  ;;  %v1202_v41 = vadd.f32 %v1201_v45, %v1200_v54  ;;  %v1066_v14 = vrot.slane %v1065_v39, 2 }
 0x21b   :  { %v1376_v59 = vmul.f32 %v2035_v46, %v2681_v26  ;;  %v1182_v34 = vrot.slane %v1181_v40, 1  ;;  %v1076_v62 = vadd.f32 %v1075_v42, %v1074_v33  ;;  %v1192_v63 = vrot.slane %v1191_v27, 4 }
 0x21c   :  { %v2037_v31 = vpop.eup %2036  ;;  %v1330_v44 = vmax.f32 %v1314_v53, 0.0  ;;  %v1297_v37 = vmul.f32 %v2688_v30, %v2688_v30  ;;  %v1203_v24 = vrot.slane %v1202_v41, 1  ;;  %v1067_v0 = vadd.f32 %v1066_v14, %v1065_v39 }
 0x21d   :  { %v1392_v1 = vmul.f32 %v1376_v59, %v2629_v20  ;;  %v1430_v32 = vrot.slane %v1376_v59, %v2321_v60  ;;  %v1375_v18 = vmul.f32 %v2037_v31, %v2681_v26  ;;  %v1183_v36 = vadd.f32 %v1182_v34, %v1181_v40 }
 0x21e   :  { %v1348_v38 = vadd.f32 1e-05, %v1330_v44  ;;  %v1204_v2 = vadd.f32 %v1203_v24, %v1202_v41  ;;  %v2701_v25 = vmul.f32 0.125, %v1076_v62  ;;  %v1068_v3 = vrot.slane %v1067_v0, 1 }
 0x21f   :  { %v2039_v50 = vpop.eup %2038  ;;  %v1408_v9 = vsub.f32 %v2694_v16, %v1392_v1  ;;  %v1488_v55 = vmul.f32 %v2601_v15, %v1430_v32  ;;  %v1391_v6 = vmul.f32 %v1375_v18, %v2635_v4  ;;  %v1426_v57 = vrot.slane %v1375_v18, %v2321_v60  ;;  %v2713_v15 = vpop.f32.mrf.mxu1 }
 0x220   :  { %v1378_v20 = vmul.f32 %v2039_v50, %v2681_v26  ;;  %2042 = vrsqrt.f32 %v1348_v38  ;;  %v1281_v22 = vmul.f32 0.125, %v1183_v36  ;;  %v1284_v61 = vmul.f32 0.125, %v1204_v2 }
 0x221   :  { %v2041_v8 = vpop.eup %2040  ;;  %v1510_v52 = vrot.slane %v1408_v9, %v2321_v60  ;;  %v1407_v11 = vsub.f32 %v2694_v16, %v1391_v6  ;;  %v1487_v13 = vmul.f32 %v1426_v57, %v2607_v49  ;;  %v1300_v54 = vmul.f32 %v2701_v25, %v2701_v25  ;;  %v2727_v41 = vpop.f32.mrf.mxu1 }
 0x222   :  { %v1394_v4 = vmul.f32 %v1378_v20, %v2641_v43  ;;  %v1438_v19 = vrot.slane %v1378_v20, %v2321_v60  ;;  %v1377_v21 = vmul.f32 %v2041_v8, %v2681_v26  ;;  %v1313_v47 = vsub.f32 %v1281_v22, %v1297_v37 }
 0x223   :  { %v2718_v33 = vadd.f32 %v1510_v52, %v1488_v55  ;;  %v1506_v17 = vrot.slane %v1407_v11, %v2321_v60  ;;  %v1316_v35 = vsub.f32 %v1284_v61, %v1300_v54  ;;  %v1069_v29 = vadd.f32 %v1068_v3, %v1067_v0  ;;  %v2745_v32 = vpop.f32.mrf.mxu1 }
 0x224   :  { %v1410_v49 = vsub.f32 %v2694_v16, %v1394_v4  ;;  %v1490_v45 = vmul.f32 %v2614_v56, %v1438_v19  ;;  %v1393_v39 = vmul.f32 %v1377_v21, %v2649_v7  ;;  %v1434_v40 = vrot.slane %v1377_v21, %v2321_v60 }
 0x225   :  { %v2725_v43 = vadd.f32 %v1506_v17, %v1487_v13  ;;  %v1329_v42 = vmax.f32 %v1313_v47, 0.0  ;;  %v1332_v46 = vmax.f32 %v1316_v35, 0.0  ;;  %v1193_v53 = vadd.f32 %v1192_v63, %v1191_v27 }
 0x226   :  { %v1518_v14 = vrot.slane %v1410_v49, %v2321_v60  ;;  %v1409_v59 = vsub.f32 %v2694_v16, %v1393_v39  ;;  %v1489_v34 = vmul.f32 %v1434_v40, %v2621_v48  ;;  %v2732_v62 = vmul.f32 0.125, %v1069_v29 }
 0x227   :  { %v1347_v56 = vadd.f32 1e-05, %v1329_v42  ;;  %v1350_v31 = vadd.f32 1e-05, %v1332_v46  ;;  %v1194_v7 = vrot.slane %v1193_v53, 2  ;;  %v1085_v44 = vrot.slane %v2686_v10, 4 }
 0x228   :  { %v2735_v37 = vadd.f32 %v1518_v14, %v1490_v45  ;;  %v1514_v24 = vrot.slane %v1409_v59, %v2321_v60  ;;  %v1299_v27 = vmul.f32 %v2732_v62, %v2732_v62  ;;  %v1142_v63 = vmul.f32 %v2672_v28, %v2672_v28 }
 0x229   :  { %2044 = vrsqrt.f32 %v1347_v56  ;;  %v1195_v0 = vadd.f32 %v1194_v7, %v1193_v53  ;;  %v1086_v48 = vadd.f32 %v1085_v44, %v2686_v10  ;;  %v1077_v1 = vsel %vm229_vm1, %v2713_v15, 0.0 }
 0x22a   :  { %v2747_v18 = vadd.f32 %v1514_v24, %v1489_v34  ;;  %2046 = vrsqrt.f32 %v1350_v31  ;;  %v1212_v36 = vsel %vm229_vm1, %v1142_v63, 0.0  ;;  %v1078_v38 = vrot.slane %v1077_v1, 4 }
 0x22b   :  { %v1196_v2 = vrot.slane %v1195_v0, 1  ;;  %v1087_v3 = vrot.slane %v1086_v48, 2  ;;  %v1213_v50 = vrot.slane %v1212_v36, 4  ;;  %v1141_v9 = vmul.f32 %v2713_v15, %v2713_v15 }
 0x22c   :  { %v1079_v55 = vadd.f32 %v1078_v38, %v1077_v1  ;;  %v1098_v10 = vsel %vm229_vm1, %v2727_v41, 0.0  ;;  %v1144_v6 = vmul.f32 %v2727_v41, %v2727_v41  ;;  %v2758_v57 = vsel %vm229_vm1, %v2745_v32, 0.0 }
 0x22d   :  { %v2043_v20 = vpop.eup %2042  ;;  %v1197_v22 = vadd.f32 %v1196_v2, %v1195_v0  ;;  %v1088_v61 = vadd.f32 %v1087_v3, %v1086_v48  ;;  %v1214_v8 = vadd.f32 %v1213_v50, %v1212_v36  ;;  %v1205_v52 = vsel %vm229_vm1, %v1141_v9, 0.0 }
 0x22e   :  { %v1380_v11 = vmul.f32 %v2043_v20, %v2681_v26  ;;  %v1080_v13 = vrot.slane %v1079_v55, 2  ;;  %v1206_v54 = vrot.slane %v1205_v52, 4  ;;  %v1099_v4 = vrot.slane %v1098_v10, 4 }
 0x22f   :  { %v1283_v19 = vmul.f32 0.125, %v1197_v22  ;;  %v1089_v21 = vrot.slane %v1088_v61, 1  ;;  %v1215_v47 = vrot.slane %v1214_v8, 2  ;;  %v1226_v17 = vsel %vm229_vm1, %v1144_v6, 0.0 }
 0x230   :  { %v1396_v35 = vmul.f32 %v1380_v11, %v2668_v12  ;;  %v1446_v29 = vrot.slane %v1380_v11, %v2321_v60  ;;  %v1081_v49 = vadd.f32 %v1080_v13, %v1079_v55  ;;  %v1207_v45 = vadd.f32 %v1206_v54, %v1205_v52 }
 0x231   :  { %v1315_v39 = vsub.f32 %v1283_v19, %v1299_v27  ;;  %v1090_v40 = vadd.f32 %v1089_v21, %v1088_v61  ;;  %v1216_v42 = vadd.f32 %v1215_v47, %v1214_v8  ;;  %v1100_v46 = vadd.f32 %v1099_v4, %v1098_v10 }
 0x232   :  { %v1412_v53 = vsub.f32 %v2694_v16, %v1396_v35  ;;  %v1492_v14 = vmul.f32 %v2631_v58, %v1446_v29  ;;  %v1082_v59 = vrot.slane %v1081_v49, 1  ;;  %v1208_v34 = vrot.slane %v1207_v45, 2 }
 0x233   :  { %v1331_v56 = vmax.f32 %v1315_v39, 0.0  ;;  %v1217_v31 = vrot.slane %v1216_v42, 1  ;;  %v2767_v7 = vmul.f32 0.125, %v1090_v40  ;;  %v1101_v44 = vrot.slane %v1100_v46, 2 }
 0x234   :  { %v1526_v12 = vrot.slane %v1412_v53, %v2321_v60  ;;  %v1083_v24 = vadd.f32 %v1082_v59, %v1081_v49  ;;  %v1209_v63 = vadd.f32 %v1208_v34, %v1207_v45  ;;  %v1227_v0 = vrot.slane %v1226_v17, 4  ;;  %v2788_v45 = vpop.f32.mrf.mxu1 }
 0x235   :  { %v1349_v27 = vadd.f32 1e-05, %v1331_v56  ;;  %v1218_v48 = vadd.f32 %v1217_v31, %v1216_v42  ;;  %v1302_v1 = vmul.f32 %v2767_v7, %v2767_v7  ;;  %v1102_v36 = vadd.f32 %v1101_v44, %v1100_v46 }
 0x236   :  { %v2045_v38 = vpop.eup %2044  ;;  %v2772_v58 = vadd.f32 %v1526_v12, %v1492_v14  ;;  %v1210_v2 = vrot.slane %v1209_v63, 1  ;;  %v2774_v3 = vmul.f32 0.125, %v1083_v24  ;;  %v1228_v50 = vadd.f32 %v1227_v0, %v1226_v17  ;;  %v2804_v12 = vpop.f32.mrf.mxu1 }
 0x237   :  { %v2047_v9 = vpop.eup %2046  ;;  %v1379_v55 = vmul.f32 %v2045_v38, %v2681_v26  ;;  %2048 = vrsqrt.f32 %v1349_v27  ;;  %v1286_v10 = vmul.f32 0.125, %v1218_v48  ;;  %v1103_v6 = vrot.slane %v1102_v36, 1 }
 0x238   :  { %v1382_v20 = vmul.f32 %v2047_v9, %v2681_v26  ;;  %v1211_v22 = vadd.f32 %v1210_v2, %v1209_v63  ;;  %v1301_v61 = vmul.f32 %v2774_v3, %v2774_v3  ;;  %v1229_v8 = vrot.slane %v1228_v50, 2 }
 0x239   :  { %v1395_v52 = vmul.f32 %v1379_v55, %v2688_v30  ;;  %v1442_v11 = vrot.slane %v1379_v55, %v2321_v60  ;;  %v1318_v13 = vsub.f32 %v1286_v10, %v1302_v1  ;;  %v1104_v54 = vadd.f32 %v1103_v6, %v1102_v36 }
 0x23a   :  { %v1398_v4 = vmul.f32 %v1382_v20, %v2701_v25  ;;  %v1454_v19 = vrot.slane %v1382_v20, %v2321_v60  ;;  %v1285_v21 = vmul.f32 0.125, %v1211_v22  ;;  %v1230_v47 = vadd.f32 %v1229_v8, %v1228_v50 }
 0x23b   :  { %v1411_v17 = vsub.f32 %v2694_v16, %v1395_v52  ;;  %v1491_v35 = vmul.f32 %v1442_v11, %v2643_v5  ;;  %v1334_v29 = vmax.f32 %v1318_v13, 0.0  ;;  %v2786_v49 = vmul.f32 0.125, %v1104_v54 }
 0x23c   :  { %v1414_v30 = vsub.f32 %v2694_v16, %v1398_v4  ;;  %v1494_v39 = vmul.f32 %v2654_v23, %v1454_v19  ;;  %v1317_v40 = vsub.f32 %v1285_v21, %v1301_v61  ;;  %v1231_v42 = vrot.slane %v1230_v47, 1 }
 0x23d   :  { %v1522_v25 = vrot.slane %v1411_v17, %v2321_v60  ;;  %v1352_v46 = vadd.f32 1e-05, %v1334_v29  ;;  %v1304_v53 = vmul.f32 %v2786_v49, %v2786_v49  ;;  %v1092_v14 = vrot.slane %v2758_v57, 4 }
 0x23e   :  { %v1534_v5 = vrot.slane %v1414_v30, %v2321_v60  ;;  %v1333_v59 = vmax.f32 %v1317_v40, 0.0  ;;  %v1232_v34 = vadd.f32 %v1231_v42, %v1230_v47  ;;  %v1143_v56 = vmul.f32 %v2745_v32, %v2745_v32 }
 0x23f   :  { %v2799_v31 = vadd.f32 %v1522_v25, %v1491_v35  ;;  %2050 = vrsqrt.f32 %v1352_v46  ;;  %v1093_v23 = vadd.f32 %v1092_v14, %v2758_v57  ;;  %v1112_v44 = vsel %vm229_vm1, %v2788_v45, 0.0  ;;  %v2820_v46 = vpop.f32.mrf.mxu1 }
 0x240   :  { %v2806_v24 = vadd.f32 %v1534_v5, %v1494_v39  ;;  %v1351_v63 = vadd.f32 1e-05, %v1333_v59  ;;  %v1288_v0 = vmul.f32 0.125, %v1232_v34  ;;  %v1219_v27 = vsel %vm229_vm1, %v1143_v56, 0.0 }
 0x241   :  { %v1094_v48 = vrot.slane %v1093_v23, 2  ;;  %v1220_v1 = vrot.slane %v1219_v27, 4  ;;  %v1113_v36 = vrot.slane %v1112_v44, 4  ;;  %v1146_v38 = vmul.f32 %v2788_v45, %v2788_v45 }
 0x242   :  { %2052 = vrsqrt.f32 %v1351_v63  ;;  %v1320_v2 = vsub.f32 %v1288_v0, %v1304_v53  ;;  %v1105_v57 = vsel %vm229_vm1, %v2804_v12, 0.0  ;;  %v1145_v50 = vmul.f32 %v2804_v12, %v2804_v12 }
 0x243   :  { %v1095_v9 = vadd.f32 %v1094_v48, %v1093_v23  ;;  %v1221_v55 = vadd.f32 %v1220_v1, %v1219_v27  ;;  %v1114_v10 = vadd.f32 %v1113_v36, %v1112_v44  ;;  %v1240_v6 = vsel %vm229_vm1, %v1146_v38, 0.0 }
 0x244   :  { %v2049_v20 = vpop.eup %2048  ;;  %v1336_v22 = vmax.f32 %v1320_v2, 0.0  ;;  %v1241_v61 = vrot.slane %v1240_v6, 4  ;;  %v1106_v8 = vrot.slane %v1105_v57, 4  ;;  %v1233_v52 = vsel %vm229_vm1, %v1145_v50, 0.0 }
 0x245   :  { %v1381_v11 = vmul.f32 %v2049_v20, %v2681_v26  ;;  %v1096_v13 = vrot.slane %v1095_v9, 1  ;;  %v1222_v54 = vrot.slane %v1221_v55, 2  ;;  %v1115_v4 = vrot.slane %v1114_v10, 2 }
 0x246   :  { %v1354_v19 = vadd.f32 1e-05, %v1336_v22  ;;  %v1242_v21 = vadd.f32 %v1241_v61, %v1240_v6  ;;  %v1107_v47 = vadd.f32 %v1106_v8, %v1105_v57  ;;  %v1234_v17 = vrot.slane %v1233_v52, 4 }
 0x247   :  { %v1397_v35 = vmul.f32 %v1381_v11, %v2732_v62  ;;  %v1450_v29 = vrot.slane %v1381_v11, %v2321_v60  ;;  %v1097_v30 = vadd.f32 %v1096_v13, %v1095_v9  ;;  %v1223_v39 = vadd.f32 %v1222_v54, %v1221_v55 }
 0x248   :  { %2054 = vrsqrt.f32 %v1354_v19  ;;  %v1116_v40 = vadd.f32 %v1115_v4, %v1114_v10  ;;  %v1243_v42 = vrot.slane %v1242_v21, 2  ;;  %v1108_v25 = vrot.slane %v1107_v47, 2 }
 0x249   :  { %v1413_v53 = vsub.f32 %v2694_v16, %v1397_v35  ;;  %v1493_v14 = vmul.f32 %v1450_v29, %v2665_v51  ;;  %v1224_v5 = vrot.slane %v1223_v39, 1  ;;  %v2824_v59 = vmul.f32 0.125, %v1097_v30 }
 0x24a   :  { %v1117_v34 = vrot.slane %v1116_v40, 1  ;;  %v1244_v56 = vadd.f32 %v1243_v42, %v1242_v21  ;;  %v1109_v62 = vadd.f32 %v1108_v25, %v1107_v47  ;;  %v1235_v23 = vadd.f32 %v1234_v17, %v1233_v52 }
 0x24b   :  { %v1530_v44 = vrot.slane %v1413_v53, %v2321_v60  ;;  %v1225_v63 = vadd.f32 %v1224_v5, %v1223_v39  ;;  %v1303_v0 = vmul.f32 %v2824_v59, %v2824_v59  ;;  %v1126_v27 = vsel %vm229_vm1, %v2820_v46, 0.0 }
 0x24c   :  { %v2051_v48 = vpop.eup %2050  ;;  %v1118_v1 = vadd.f32 %v1117_v34, %v1116_v40  ;;  %v1245_v36 = vrot.slane %v1244_v56, 1  ;;  %v1110_v51 = vrot.slane %v1109_v62, 1  ;;  %v1236_v38 = vrot.slane %v1235_v23, 2 }
 0x24d   :  { %v2831_v2 = vadd.f32 %v1530_v44, %v1493_v14  ;;  %v1384_v57 = vmul.f32 %v2051_v48, %v2681_v26  ;;  %v1287_v50 = vmul.f32 0.125, %v1225_v63  ;;  %v1127_v9 = vrot.slane %v1126_v27, 4 }
 0x24e   :  { %v1246_v55 = vadd.f32 %v1245_v36, %v1244_v56  ;;  %v2834_v10 = vmul.f32 0.125, %v1118_v1  ;;  %v1111_v6 = vadd.f32 %v1110_v51, %v1109_v62  ;;  %v1237_v20 = vadd.f32 %v1236_v38, %v1235_v23  ;;  %v2852_v56 = vpop.f32.mrf.mxu1 }
 0x24f   :  { %v2053_v22 = vpop.eup %2052  ;;  %v1400_v61 = vmul.f32 %v1384_v57, %v2767_v7  ;;  %v1462_v8 = vrot.slane %v1384_v57, %v2321_v60  ;;  %v1319_v52 = vsub.f32 %v1287_v50, %v1303_v0  ;;  %v1128_v11 = vadd.f32 %v1127_v9, %v1126_v27 }
 0x250   :  { %v1383_v13 = vmul.f32 %v2053_v22, %v2681_v26  ;;  %v1290_v54 = vmul.f32 0.125, %v1246_v55  ;;  %v1306_v4 = vmul.f32 %v2834_v10, %v2834_v10  ;;  %v1238_v19 = vrot.slane %v1237_v20, 1 }
 0x251   :  { %v1416_v21 = vsub.f32 %v2694_v16, %v1400_v61  ;;  %v1496_v47 = vmul.f32 %v2672_v28, %v1462_v8  ;;  %v1335_v17 = vmax.f32 %v1319_v52, 0.0  ;;  %v2843_v35 = vmul.f32 0.125, %v1111_v6 }
 0x252   :  { %v1399_v7 = vmul.f32 %v1383_v13, %v2774_v3  ;;  %v1458_v29 = vrot.slane %v1383_v13, %v2321_v60  ;;  %v1322_v30 = vsub.f32 %v1290_v54, %v1306_v4  ;;  %v1239_v39 = vadd.f32 %v1238_v19, %v1237_v20  ;;  %v2878_v4 = vld [vmem:[%s3068_s3 + $0x4] ss:$0 sm:$0xff] }
 0x253   :  { %v1542_v40 = vrot.slane %v1416_v21, %v2321_v60  ;;  %v1353_v42 = vadd.f32 1e-05, %v1335_v17  ;;  %v1305_v25 = vmul.f32 %v2843_v35, %v2843_v35  ;;  %v1129_v53 = vrot.slane %v1128_v11, 2 }
 0x254   :  { %v1415_v14 = vsub.f32 %v2694_v16, %v1399_v7  ;;  %v1495_v28 = vmul.f32 %v1458_v29, %v2713_v15  ;;  %v1338_v5 = vmax.f32 %v1322_v30, 0.0  ;;  %v1289_v34 = vmul.f32 0.125, %v1239_v39 }
 0x255   :  { %v2055_v3 = vpop.eup %2054  ;;  %v2854_v62 = vadd.f32 %v1542_v40, %v1496_v47  ;;  %2056 = vrsqrt.f32 %v1353_v42  ;;  %v1130_v23 = vadd.f32 %v1129_v53, %v1128_v11  ;;  %v1148_v44 = vmul.f32 %v2820_v46, %v2820_v46 }
 0x256   :  { %v1538_v63 = vrot.slane %v1415_v14, %v2321_v60  ;;  %v1386_v0 = vmul.f32 %v2055_v3, %v2681_v26  ;;  %v1356_v27 = vadd.f32 1e-05, %v1338_v5  ;;  %v1321_v48 = vsub.f32 %v1289_v34, %v1305_v25 }
 0x257   :  { %v1131_v1 = vrot.slane %v1130_v23, 1  ;;  %v1254_v15 = vsel %vm229_vm1, %v1148_v44, 0.0  ;;  %v1119_v36 = vsel %vm229_vm1, %v2852_v56, 0.0  ;;  %v1147_v51 = vmul.f32 %v2852_v56, %v2852_v56 }
 0x258   :  { %v2865_v38 = vadd.f32 %v1538_v63, %v1495_v28  ;;  %v1402_v57 = vmul.f32 %v1386_v0, %v2786_v49  ;;  %v1470_v50 = vrot.slane %v1386_v0, %v2321_v60  ;;  %2058 = vrsqrt.f32 %v1356_v27 }
 0x259   :  { %v1337_v9 = vmax.f32 %v1321_v48, 0.0  ;;  %v1132_v55 = vadd.f32 %v1131_v1, %v1130_v23  ;;  %v1255_v6 = vrot.slane %v1254_v15, 4  ;;  %v1120_v20 = vrot.slane %v1119_v36, 4 }
 0x25a   :  { %v1418_v22 = vsub.f32 %v2694_v16, %v1402_v57  ;;  %v1498_v61 = vmul.f32 %v2727_v41, %v1470_v50  ;;  %v1247_v8 = vsel %vm229_vm1, %v1147_v51, 0.0  ;;  %v1584_v52 = vmul.f32 0.01, %v2718_v33 }
 0x25b   :  { %v1355_v11 = vadd.f32 1e-05, %v1337_v9  ;;  %v1256_v13 = vadd.f32 %v1255_v6, %v1254_v15  ;;  %v2873_v54 = vmul.f32 0.125, %v1132_v55  ;;  %v1121_v49 = vadd.f32 %v1120_v20, %v1119_v36 }
 0x25c   :  { %v1550_v19 = vrot.slane %v1418_v22, %v2321_v60  ;;  %v1248_v21 = vrot.slane %v1247_v8, 4  ;;  %v1600_v47 = vmax.f32 %v2718_v33, %v1584_v52  ;;  %v1583_v41 = vmul.f32 0.01, %v2725_v43 }
 0x25d   :  { %2060 = vrsqrt.f32 %v1355_v11  ;;  %v1257_v17 = vrot.slane %v1256_v13, 2  ;;  %v1308_v7 = vmul.f32 %v2873_v54, %v2873_v54  ;;  %v1122_v29 = vrot.slane %v1121_v49, 2 }
 0x25e   :  { %v2885_v30 = vadd.f32 %v1550_v19, %v1498_v61  ;;  %v1249_v39 = vadd.f32 %v1248_v21, %v1247_v8  ;;  %v1622_v40 = vmul.f32 %v2878_v4, %v1600_v47  ;;  %v1599_v42 = vmax.f32 %v2725_v43, %v1583_v41 }
 0x25f   :  { %v1258_v25 = vadd.f32 %v1257_v17, %v1256_v13  ;;  %v1123_v53 = vadd.f32 %v1122_v29, %v1121_v49  ;;  %v1586_v14 = vmul.f32 0.01, %v2735_v37  ;;  %v1585_v33 = vmul.f32 0.01, %v2747_v18 }
 0x260   :  { %v1250_v28 = vrot.slane %v1249_v39, 2  ;;  %v1640_v5 = vsel %vm229_vm1, %v1622_v40, 0.0  ;;  %v1621_v34 = vmul.f32 %v2878_v4, %v1599_v42  ;;  %v1587_v3 = vmul.f32 0.01, %v2799_v31 }
 0x261   :  { %v1259_v23 = vrot.slane %v1258_v25, 1  ;;  %v1124_v44 = vrot.slane %v1123_v53, 1  ;;  %1641 = vadd.xlane.f32.xlu0 %v1640_v5  ;;  %v1602_v63 = vmax.f32 %v2735_v37, %v1586_v14  ;;  %v1601_v43 = vmax.f32 %v2747_v18, %v1585_v33 }
 0x262   :  { %v2057_v0 = vpop.eup %2056  ;;  %v1251_v27 = vadd.f32 %v1250_v28, %v1249_v39  ;;  %v1637_v48 = vsel %vm229_vm1, %v1621_v34, 0.0  ;;  %v1603_v1 = vmax.f32 %v2799_v31, %v1587_v3  ;;  %v1588_v15 = vmul.f32 0.01, %v2772_v58 }
 0x263   :  { %v1385_v36 = vmul.f32 %v2057_v0, %v2681_v26  ;;  %v1260_v51 = vadd.f32 %v1259_v23, %v1258_v25  ;;  %v1125_v57 = vadd.f32 %v1124_v44, %v1123_v53  ;;  %v1624_v50 = vmul.f32 %v2878_v4, %v1602_v63 }
 0x264   :  { %v1252_v9 = vrot.slane %v1251_v27, 1  ;;  %v1623_v55 = vmul.f32 %v2878_v4, %v1601_v43  ;;  %v1625_v37 = vmul.f32 %v2878_v4, %v1603_v1  ;;  %v1604_v18 = vmax.f32 %v2772_v58, %v1588_v15 }
 0x265   :  { %v2059_v6 = vpop.eup %2058  ;;  %v1401_v20 = vmul.f32 %v1385_v36, %v2824_v59  ;;  %v1466_v31 = vrot.slane %v1385_v36, %v2321_v60  ;;  %v1292_v22 = vmul.f32 0.125, %v1260_v51  ;;  %v2906_v61 = vmul.f32 0.125, %v1125_v57  ;;  %1638 = vadd.xlane.f32.xlu0 %v1637_v48 }
 0x266   :  { %v1388_v8 = vmul.f32 %v2059_v6, %v2681_v26  ;;  %v1253_v52 = vadd.f32 %v1252_v9, %v1251_v27  ;;  %v1646_v11 = vsel %vm229_vm1, %v1624_v50, 0.0  ;;  %v1643_v13 = vsel %vm229_vm1, %v1623_v55, 0.0 }
 0x267   :  { %v1417_v49 = vsub.f32 %v2694_v16, %v1401_v20  ;;  %v1497_v58 = vmul.f32 %v1466_v31, %v2745_v32  ;;  %v1324_v19 = vsub.f32 %v1292_v22, %v1308_v7  ;;  %v1307_v59 = vmul.f32 %v2906_v61, %v2906_v61  ;;  %1647 = vadd.xlane.f32.xlu1 %v1646_v11 }
 0x268   :  { %v1404_v21 = vmul.f32 %v1388_v8, %v2834_v10  ;;  %v1478_v47 = vrot.slane %v1388_v8, %v2321_v60  ;;  %v1291_v41 = vmul.f32 0.125, %v1253_v52  ;;  %v1649_v17 = vsel %vm229_vm1, %v1625_v37, 0.0 }
 0x269   :  { %v1546_v29 = vrot.slane %v1417_v49, %v2321_v60  ;;  %v1340_v39 = vmax.f32 %v1324_v19, 0.0  ;;  %1650 = vadd.xlane.f32.xlu0 %v1649_v17  ;;  %v1626_v40 = vmul.f32 %v2878_v4, %v1604_v18  ;;  %v1589_v32 = vmul.f32 0.01, %v2831_v2 }
 0x26a   :  { %v2061_v7 = vpop.eup %2060  ;;  %v1420_v42 = vsub.f32 %v2694_v16, %v1404_v21  ;;  %v1500_v25 = vmul.f32 %v2788_v45, %v1478_v47  ;;  %v1323_v53 = vsub.f32 %v1291_v41, %v1307_v59  ;;  %v1590_v10 = vmul.f32 0.01, %v2806_v24 }
 0x26b   :  { %v1577_v14 = vadd.f32 %v1546_v29, %v1497_v58  ;;  %v1387_v33 = vmul.f32 %v2061_v7, %v2681_v26  ;;  %v1358_v28 = vadd.f32 1e-05, %v1340_v39  ;;  %1644 = vadd.xlane.f32.xlu1 %v1643_v13  ;;  %v1652_v5 = vsel %vm229_vm1, %v1626_v40, 0.0 }
 0x26c   :  { %v1558_v34 = vrot.slane %v1420_v42, %v2321_v60  ;;  %v1339_v3 = vmax.f32 %v1323_v53, 0.0  ;;  %v1605_v23 = vmax.f32 %v2831_v2, %v1589_v32  ;;  %v1606_v44 = vmax.f32 %v2806_v24, %v1590_v10 }
 0x26d   :  { %v1403_v63 = vmul.f32 %v1387_v33, %v2843_v35  ;;  %v1474_v45 = vrot.slane %v1387_v33, %v2321_v60  ;;  %2062 = vrsqrt.f32 %v1358_v28  ;;  %v1591_v43 = vmul.f32 0.01, %v2865_v38 }
 0x26e   :  { %v1580_v0 = vadd.f32 %v1558_v34, %v1500_v25  ;;  %v1357_v27 = vadd.f32 1e-05, %v1339_v3  ;;  %v1627_v48 = vmul.f32 %v2878_v4, %v1605_v23  ;;  %v1628_v1 = vmul.f32 %v2878_v4, %v1606_v44 }
 0x26f   :  { %v1419_v15 = vsub.f32 %v2694_v16, %v1403_v63  ;;  %1653 = vadd.xlane.f32.xlu1 %v1652_v5  ;;  %v1607_v2 = vmax.f32 %v2865_v38, %v1591_v43  ;;  %v1592_v24 = vmul.f32 0.01, %v2854_v62  ;;  %v1499_v35 = vmul.f32 %v1474_v45, %v2804_v12 }
 0x270   :  { %2064 = vrsqrt.f32 %v1357_v27  ;;  %v1655_v36 = vsel %vm229_vm1, %v1627_v48, 0.0  ;;  %v1593_v51 = vmul.f32 0.01, %v1577_v14  ;;  %v1594_v55 = vmul.f32 0.01, %v2885_v30 }
 0x271   :  { %v1554_v57 = vrot.slane %v1419_v15, %v2321_v60  ;;  %1656 = vadd.xlane.f32.xlu0 %v1655_v36  ;;  %v1629_v50 = vmul.f32 %v2878_v4, %v1607_v2  ;;  %v1608_v9 = vmax.f32 %v2854_v62, %v1592_v24  ;;  %v1658_v37 = vsel %vm229_vm1, %v1628_v1, 0.0 }
 0x272   :  { %v1609_v38 = vmax.f32 %v1577_v14, %v1593_v51  ;;  %v1596_v18 = vmul.f32 0.01, %v1580_v0  ;;  %v1610_v31 = vmax.f32 %v2885_v30, %v1594_v55 }
 0x273   :  { %v1579_v6 = vadd.f32 %v1554_v57, %v1499_v35  ;;  %1659 = vadd.xlane.f32.xlu1 %v1658_v37  ;;  %v1661_v12 = vsel %vm229_vm1, %v1629_v50, 0.0  ;;  %v1630_v20 = vmul.f32 %v2878_v4, %v1608_v9 }
 0x274   :  { %v1631_v22 = vmul.f32 %v2878_v4, %v1609_v38  ;;  %v1632_v11 = vmul.f32 %v2878_v4, %v1610_v31  ;;  %v1612_v13 = vmax.f32 %v1580_v0, %v1596_v18 }
 0x275   :  { %1662 = vadd.xlane.f32.xlu0 %v1661_v12  ;;  %v1595_v8 = vmul.f32 0.01, %v1579_v6  ;;  %v1664_v62 = vsel %vm229_vm1, %v1630_v20, 0.0 }
 0x276   :  { %v1667_v52 = vsel %vm229_vm1, %v1631_v22, 0.0  ;;  %v1670_v59 = vsel %vm229_vm1, %v1632_v11, 0.0  ;;  %v1634_v30 = vmul.f32 %v2878_v4, %v1612_v13 }
 0x277   :  { %1665 = vadd.xlane.f32.xlu1 %v1664_v62  ;;  %v1611_v49 = vmax.f32 %v1579_v6, %v1595_v8 }
 0x278   :  { %v1676_v40 = vsel %vm229_vm1, %v1634_v30, 0.0 }
 0x279   :  { %1668 = vadd.xlane.f32.xlu0 %v1667_v52  ;;  %v1633_v58 = vmul.f32 %v2878_v4, %v1611_v49 }
 0x27a   :  { %v2063_v19 = vpop.eup %2062 }
 0x27b   :  { %v1390_v21 = vmul.f32 %v2063_v19, %v2681_v26  ;;  %1671 = vadd.xlane.f32.xlu1 %v1670_v59  ;;  %v1673_v47 = vsel %vm229_vm1, %v1633_v58, 0.0 }
 0x27d   :  { %v2065_v41 = vpop.eup %2064  ;;  %v1406_v17 = vmul.f32 %v1390_v21, %v2873_v54  ;;  %v1486_v29 = vrot.slane %v1390_v21, %v2321_v60  ;;  %1674 = vadd.xlane.f32.xlu0 %v1673_v47 }
 0x27e   :  { %v1389_v39 = vmul.f32 %v2065_v41, %v2681_v26 }
 0x27f   :  { %v1422_v32 = vsub.f32 %v2694_v16, %v1406_v17  ;;  %1677 = vadd.xlane.f32.xlu1 %v1676_v40  ;;  %v1502_v25 = vmul.f32 %v2820_v46, %v1486_v29 }
 0x280   :  { %v1405_v7 = vmul.f32 %v1389_v39, %v2906_v61  ;;  %v1482_v42 = vrot.slane %v1389_v39, %v2321_v60 }
 0x281   :  { %v1566_v53 = vrot.slane %v1422_v32, %v2321_v60 }
 0x282   :  { %v1421_v54 = vsub.f32 %v2694_v16, %v1405_v7  ;;  %v1501_v14 = vmul.f32 %v1482_v42, %v2852_v56  ;;  %v2975_v16 = vld [vmem:[%s3068_s3 + $0x5] ss:$0 sm:$0xff] }
 0x283   :  { %v1582_v10 = vadd.f32 %v1566_v53, %v1502_v25 }
 0x284   :  { %v1562_v26 = vrot.slane %v1421_v54, %v2321_v60 }
 0x285   :  { %v1598_v33 = vmul.f32 0.01, %v1582_v10 }
 0x286   :  { %v1581_v28 = vadd.f32 %v1562_v26, %v1501_v14 }
 0x287   :  { %v1614_v5 = vmax.f32 %v1582_v10, %v1598_v33 }
 0x288   :  { %v1597_v34 = vmul.f32 0.01, %v1581_v28 }
 0x289   :  { %v1636_v3 = vmul.f32 %v2878_v4, %v1614_v5 }
 0x28a   :  { %v1613_v61 = vmax.f32 %v1581_v28, %v1597_v34 }
 0x28b   :  { %v1682_v23 = vsel %vm229_vm1, %v1636_v3, 0.0 }
 0x28c   :  { %v1635_v46 = vmul.f32 %v2878_v4, %v1613_v61  ;;  %1683 = vadd.xlane.f32.xlu1 %v1682_v23 }
 0x28e   :  { %v1679_v44 = vsel %vm229_vm1, %v1635_v46, 0.0 }
 0x28f   :  { %1680 = vadd.xlane.f32.xlu0 %v1679_v44 }
 0x2ea   :  { %v1642_v60 = vpop.xlane.xlu0 %1641 }
 0x2eb   :  { %v1690_v56 = vadd.f32 %v2975_v16, %v1642_v60 }
 0x2ed   :  { %v1706_v63 = vsub.f32 0.0, %v1690_v56 }
 0x2ee   :  { %v1639_v45 = vpop.xlane.xlu0 %1638 }
 0x2ef   :  { %v1722_v43 = vmin.f32 %v1706_v63, 80.0  ;;  %v1689_v0 = vadd.f32 %v2975_v16, %v1639_v45 }
 0x2f0   :  { %v1648_v27 = vpop.xlane.xlu1 %1647 }
 0x2f1   :  { %v1739_v48 = vmul.f32 1.442695, %v1722_v43  ;;  %v1705_v4 = vsub.f32 0.0, %v1689_v0  ;;  %v1692_v1 = vadd.f32 %v2975_v16, %v1648_v27 }
 0x2f2   :  { %v1651_v15 = vpop.xlane.xlu0 %1650 }
 0x2f3   :  { %2066 = vpow2.f32 %v1739_v48  ;;  %v1721_v2 = vmin.f32 %v1705_v4, 80.0  ;;  %v1708_v24 = vsub.f32 0.0, %v1692_v1  ;;  %v1693_v35 = vadd.f32 %v2975_v16, %v1651_v15 }
 0x2f4   :  { %v1645_v36 = vpop.xlane.xlu1 %1644 }
 0x2f5   :  { %v1737_v51 = vmul.f32 1.442695, %v1721_v2  ;;  %v1724_v57 = vmin.f32 %v1708_v24, 80.0  ;;  %v1691_v50 = vadd.f32 %v2975_v16, %v1645_v36  ;;  %v1709_v9 = vsub.f32 0.0, %v1693_v35 }
 0x2f7   :  { %2068 = vpow2.f32 %v1737_v51  ;;  %v1743_v55 = vmul.f32 1.442695, %v1724_v57  ;;  %v1707_v37 = vsub.f32 0.0, %v1691_v50  ;;  %v1725_v38 = vmin.f32 %v1709_v9, 80.0 }
 0x2f8   :  { %v1654_v18 = vpop.xlane.xlu1 %1653 }
 0x2f9   :  { %2070 = vpow2.f32 %v1743_v55  ;;  %v1723_v6 = vmin.f32 %v1707_v37, 80.0  ;;  %v1745_v12 = vmul.f32 1.442695, %v1725_v38  ;;  %v1694_v20 = vadd.f32 %v2975_v16, %v1654_v18 }
 0x2fa   :  { %v1657_v31 = vpop.xlane.xlu0 %1656 }
 0x2fb   :  { %v1741_v22 = vmul.f32 1.442695, %v1723_v6  ;;  %2072 = vpow2.f32 %v1745_v12  ;;  %v1710_v8 = vsub.f32 0.0, %v1694_v20  ;;  %v1695_v62 = vadd.f32 %v2975_v16, %v1657_v31 }
 0x2fc   :  { %v1660_v52 = vpop.xlane.xlu1 %1659 }
 0x2fd   :  { %2074 = vpow2.f32 %v1741_v22  ;;  %v1726_v11 = vmin.f32 %v1710_v8, 80.0  ;;  %v1711_v13 = vsub.f32 0.0, %v1695_v62  ;;  %v1696_v49 = vadd.f32 %v2975_v16, %v1660_v52 }
 0x2fe   :  { %v1663_v58 = vpop.xlane.xlu0 %1662 }
 0x2ff   :  { %v1747_v19 = vmul.f32 1.442695, %v1726_v11  ;;  %v1727_v59 = vmin.f32 %v1711_v13, 80.0  ;;  %v1712_v30 = vsub.f32 0.0, %v1696_v49  ;;  %v1697_v21 = vadd.f32 %v2975_v16, %v1663_v58 }
 0x300   :  { %v2067_v47 = vpop.eup %2066  ;;  %v1666_v41 = vpop.xlane.xlu1 %1665 }
 0x301   :  { %v1770_v17 = vadd.f32 1.0, %v2067_v47  ;;  %2076 = vpow2.f32 %v1747_v19  ;;  %v1749_v29 = vmul.f32 1.442695, %v1727_v59  ;;  %v1728_v39 = vmin.f32 %v1712_v30, 80.0 }
 0x302   :  { %v1713_v40 = vsub.f32 0.0, %v1697_v21  ;;  %v1698_v32 = vadd.f32 %v2975_v16, %v1666_v41  ;;  %v1669_v7 = vpop.xlane.xlu0 %1668 }
 0x303   :  { %2078 = vrcp.f32 %v1770_v17  ;;  %v1751_v42 = vmul.f32 1.442695, %v1728_v39  ;;  %v1699_v25 = vadd.f32 %v2975_v16, %v1669_v7 }
 0x304   :  { %v2069_v53 = vpop.eup %2068  ;;  %2080 = vpow2.f32 %v1749_v29  ;;  %v1729_v54 = vmin.f32 %v1713_v40, 80.0  ;;  %v1714_v10 = vsub.f32 0.0, %v1698_v32  ;;  %v1672_v14 = vpop.xlane.xlu1 %1671 }
 0x305   :  { %v1769_v26 = vadd.f32 1.0, %v2069_v53  ;;  %2082 = vpow2.f32 %v1751_v42  ;;  %v1715_v33 = vsub.f32 0.0, %v1699_v25  ;;  %v1700_v28 = vadd.f32 %v2975_v16, %v1672_v14 }
 0x306   :  { %v2071_v5 = vpop.eup %2070  ;;  %v1753_v34 = vmul.f32 1.442695, %v1729_v54  ;;  %v1730_v3 = vmin.f32 %v1714_v10, 80.0  ;;  %v1675_v61 = vpop.xlane.xlu0 %1674 }
 0x307   :  { %2084 = vrcp.f32 %v1769_v26  ;;  %v1772_v23 = vadd.f32 1.0, %v2071_v5  ;;  %v1731_v46 = vmin.f32 %v1715_v33, 80.0  ;;  %v1716_v44 = vsub.f32 0.0, %v1700_v28 }
 0x308   :  { %v2073_v60 = vpop.eup %2072  ;;  %2086 = vpow2.f32 %v1753_v34  ;;  %v1755_v56 = vmul.f32 1.442695, %v1730_v3  ;;  %v1701_v63 = vadd.f32 %v2975_v16, %v1675_v61  ;;  %v1678_v45 = vpop.xlane.xlu1 %1677 }
 0x309   :  { %2088 = vrcp.f32 %v1772_v23  ;;  %v1773_v43 = vadd.f32 1.0, %v2073_v60  ;;  %v1757_v0 = vmul.f32 1.442695, %v1731_v46  ;;  %v1732_v27 = vmin.f32 %v1716_v44, 80.0 }
 0x30a   :  { %v2075_v48 = vpop.eup %2074  ;;  %2090 = vpow2.f32 %v1755_v56  ;;  %v1717_v4 = vsub.f32 0.0, %v1701_v63  ;;  %v1702_v1 = vadd.f32 %v2975_v16, %v1678_v45 }
 0x30b   :  { %v1771_v15 = vadd.f32 1.0, %v2075_v48  ;;  %2092 = vrcp.f32 %v1773_v43  ;;  %v1759_v2 = vmul.f32 1.442695, %v1732_v27 }
 0x30c   :  { %2094 = vpow2.f32 %v1757_v0  ;;  %v1733_v24 = vmin.f32 %v1717_v4, 80.0  ;;  %v1718_v35 = vsub.f32 0.0, %v1702_v1 }
 0x30d   :  { %2096 = vrcp.f32 %v1771_v15 }
 0x30e   :  { %v2077_v36 = vpop.eup %2076  ;;  %2098 = vpow2.f32 %v1759_v2  ;;  %v1761_v51 = vmul.f32 1.442695, %v1733_v24  ;;  %v1734_v57 = vmin.f32 %v1718_v35, 80.0 }
 0x30f   :  { %v1774_v50 = vadd.f32 1.0, %v2077_v36 }
 0x310   :  { %v2079_v9 = vpop.eup %2078  ;;  %2100 = vpow2.f32 %v1761_v51  ;;  %v1763_v55 = vmul.f32 1.442695, %v1734_v57 }
 0x311   :  { %v2081_v37 = vpop.eup %2080  ;;  %v1802_v38 = vmul.f32 %v2079_v9, %v1770_v17  ;;  %2102 = vrcp.f32 %v1774_v50 }
 0x312   :  { %v2083_v18 = vpop.eup %2082  ;;  %v2991_v6 = vadd.f32 1.0, %v2081_v37  ;;  %2104 = vpow2.f32 %v1763_v55 }
 0x313   :  { %v1818_v12 = vsub.f32 2.0, %v1802_v38  ;;  %v2993_v20 = vadd.f32 1.0, %v2083_v18 }
 0x314   :  { %v2085_v31 = vpop.eup %2084  ;;  %2106 = vrcp.f32 %v2991_v6 }
 0x315   :  { %v2087_v22 = vpop.eup %2086  ;;  %v1834_v8 = vmul.f32 %v2079_v9, %v1818_v12  ;;  %v1801_v62 = vmul.f32 %v2085_v31, %v1769_v26  ;;  %2108 = vrcp.f32 %v2993_v20  ;;  %v1684_v52 = vpop.xlane.xlu1 %1683 }
 0x316   :  { %v2089_v11 = vpop.eup %2088  ;;  %v1777_v13 = vadd.f32 1.0, %v2087_v22  ;;  %v1704_v49 = vadd.f32 %v2975_v16, %v1684_v52 }
 0x317   :  { %v2091_v58 = vpop.eup %2090  ;;  %1851 = vst.msk [vmem:[%s3069_s4 + $0x8] sm:$0xff] %vm1849_vm2, %v1834_v8  ;;  %v1817_v19 = vsub.f32 2.0, %v1801_v62  ;;  %v1804_v59 = vmul.f32 %v2089_v11, %v1772_v23 }
 0x318   :  { %v2093_v30 = vpop.eup %2092  ;;  %2110 = vrcp.f32 %v1777_v13  ;;  %v1778_v21 = vadd.f32 1.0, %v2091_v58  ;;  %v1681_v47 = vpop.xlane.xlu0 %1680  ;;  %v1720_v41 = vsub.f32 0.0, %v1704_v49 }
 0x319   :  { %v2095_v17 = vpop.eup %2094  ;;  %v1833_v29 = vmul.f32 %v2085_v31, %v1817_v19  ;;  %v1820_v39 = vsub.f32 2.0, %v1804_v59  ;;  %v1805_v40 = vmul.f32 %v2093_v30, %v1773_v43  ;;  %v1703_v32 = vadd.f32 %v2975_v16, %v1681_v47 }
 0x31a   :  { %v2097_v7 = vpop.eup %2096  ;;  %2112 = vrcp.f32 %v1778_v21  ;;  %v1779_v42 = vadd.f32 1.0, %v2095_v17  ;;  %v1736_v25 = vmin.f32 %v1720_v41, 80.0 }
 0x31b   :  { %v2099_v53 = vpop.eup %2098  ;;  %1850 = vst.msk [vmem:[%s3069_s4] sm:$0xff] %vm1849_vm2, %v1833_v29  ;;  %v1836_v54 = vmul.f32 %v2089_v11, %v1820_v39  ;;  %v1803_v10 = vmul.f32 %v2097_v7, %v1771_v15  ;;  %v1821_v14 = vsub.f32 2.0, %v1805_v40  ;;  %v1719_v26 = vsub.f32 0.0, %v1703_v32 }
 0x31c   :  { %2114 = vrcp.f32 %v1779_v42  ;;  %v1780_v33 = vadd.f32 1.0, %v2099_v53  ;;  %v1767_v28 = vmul.f32 1.442695, %v1736_v25 }
 0x31d   :  { %v2101_v5 = vpop.eup %2100  ;;  %1853 = vst.msk [vmem:[%s3069_s4 + $0x18] sm:$0xff] %vm1849_vm2, %v1836_v54  ;;  %v1819_v16 = vsub.f32 2.0, %v1803_v10  ;;  %v1837_v34 = vmul.f32 %v2093_v30, %v1821_v14  ;;  %v1735_v3 = vmin.f32 %v1719_v26, 80.0 }
 0x31e   :  { %v2103_v61 = vpop.eup %2102  ;;  %2116 = vrcp.f32 %v1780_v33  ;;  %v1781_v23 = vadd.f32 1.0, %v2101_v5 }
 0x31f   :  { %v2105_v46 = vpop.eup %2104  ;;  %v1835_v44 = vmul.f32 %v2097_v7, %v1819_v16  ;;  %1854 = vst.msk [vmem:[%s3069_s4 + $0x20] sm:$0xff] %vm1849_vm2, %v1837_v34  ;;  %v1806_v60 = vmul.f32 %v2103_v61, %v1774_v50  ;;  %v1765_v56 = vmul.f32 1.442695, %v1735_v3  ;;  %2118 = vpow2.f32 %v1767_v28 }
 0x320   :  { %2120 = vrcp.f32 %v1781_v23  ;;  %v1782_v63 = vadd.f32 1.0, %v2105_v46 }
 0x321   :  { %v2107_v45 = vpop.eup %2106  ;;  %1852 = vst.msk [vmem:[%s3069_s4 + $0x10] sm:$0xff] %vm1849_vm2, %v1835_v44  ;;  %v1822_v43 = vsub.f32 2.0, %v1806_v60  ;;  %2122 = vpow2.f32 %v1765_v56 }
 0x322   :  { %v2109_v0 = vpop.eup %2108  ;;  %v1807_v27 = vmul.f32 %v2107_v45, %v2991_v6  ;;  %2124 = vrcp.f32 %v1782_v63 }
 0x323   :  { %v1838_v48 = vmul.f32 %v2103_v61, %v1822_v43  ;;  %v1808_v4 = vmul.f32 %v2109_v0, %v2993_v20 }
 0x324   :  { %v1823_v1 = vsub.f32 2.0, %v1807_v27 }
 0x325   :  { %v2111_v15 = vpop.eup %2110  ;;  %1855 = vst.msk [vmem:[%s3069_s4 + $0x28] sm:$0xff] %vm1849_vm2, %v1838_v48  ;;  %v1824_v2 = vsub.f32 2.0, %v1808_v4 }
 0x326   :  { %v1839_v24 = vmul.f32 %v2107_v45, %v1823_v1  ;;  %v1809_v35 = vmul.f32 %v2111_v15, %v1777_v13 }
 0x327   :  { %v2113_v36 = vpop.eup %2112  ;;  %v1840_v51 = vmul.f32 %v2109_v0, %v1824_v2 }
 0x328   :  { %1856 = vst.msk [vmem:[%s3069_s4 + $0x30] sm:$0xff] %vm1849_vm2, %v1839_v24  ;;  %v1825_v57 = vsub.f32 2.0, %v1809_v35  ;;  %v1810_v50 = vmul.f32 %v2113_v36, %v1778_v21 }
 0x329   :  { %v2115_v9 = vpop.eup %2114  ;;  %1857 = vst.msk [vmem:[%s3069_s4 + $0x38] sm:$0xff] %vm1849_vm2, %v1840_v51 }
 0x32a   :  { %v1841_v55 = vmul.f32 %v2111_v15, %v1825_v57  ;;  %v1826_v37 = vsub.f32 2.0, %v1810_v50  ;;  %v1811_v38 = vmul.f32 %v2115_v9, %v1779_v42 }
 0x32b   :  { %v2117_v18 = vpop.eup %2116 }
 0x32c   :  { %v2119_v6 = vpop.eup %2118  ;;  %1858 = vst.msk [vmem:[%s3069_s4 + $0x40] sm:$0xff] %vm1849_vm2, %v1841_v55  ;;  %v1842_v12 = vmul.f32 %v2113_v36, %v1826_v37  ;;  %v1827_v20 = vsub.f32 2.0, %v1811_v38  ;;  %v1812_v31 = vmul.f32 %v2117_v18, %v1780_v33 }
 0x32d   :  { %v2121_v22 = vpop.eup %2120  ;;  %v1784_v8 = vadd.f32 1.0, %v2119_v6 }
 0x32e   :  { %v2123_v62 = vpop.eup %2122  ;;  %1859 = vst.msk [vmem:[%s3069_s4 + $0x48] sm:$0xff] %vm1849_vm2, %v1842_v12  ;;  %v1843_v52 = vmul.f32 %v2115_v9, %v1827_v20  ;;  %v1828_v11 = vsub.f32 2.0, %v1812_v31  ;;  %v1813_v13 = vmul.f32 %v2121_v22, %v1781_v23 }
 0x32f   :  { %v2125_v49 = vpop.eup %2124  ;;  %v1783_v58 = vadd.f32 1.0, %v2123_v62  ;;  %2126 = vrcp.f32 %v1784_v8 }
 0x330   :  { %1860 = vst.msk [vmem:[%s3069_s4 + $0x50] sm:$0xff] %vm1849_vm2, %v1843_v52  ;;  %v1844_v19 = vmul.f32 %v2117_v18, %v1828_v11  ;;  %v1829_v59 = vsub.f32 2.0, %v1813_v13  ;;  %v1814_v30 = vmul.f32 %v2125_v49, %v1782_v63 }
 0x331   :  { %2128 = vrcp.f32 %v1783_v58 }
 0x332   :  { %1861 = vst.msk [vmem:[%s3069_s4 + $0x58] sm:$0xff] %vm1849_vm2, %v1844_v19  ;;  %v1845_v21 = vmul.f32 %v2121_v22, %v1829_v59  ;;  %v1830_v47 = vsub.f32 2.0, %v1814_v30 }
 0x334   :  { %1862 = vst.msk [vmem:[%s3069_s4 + $0x60] sm:$0xff] %vm1849_vm2, %v1845_v21  ;;  %v1846_v41 = vmul.f32 %v2125_v49, %v1830_v47 }
 0x336   :  { %1863 = vst.msk [vmem:[%s3069_s4 + $0x68] sm:$0xff] %vm1849_vm2, %v1846_v41 }
 0x33c   :  { %v2127_v17 = vpop.eup %2126 }
 0x33d   :  { %v1816_v29 = vmul.f32 %v2127_v17, %v1784_v8 }
 0x33e   :  { %v2129_v39 = vpop.eup %2128 }
 0x33f   :  { %v1815_v40 = vmul.f32 %v2129_v39, %v1783_v58  ;;  %v1832_v32 = vsub.f32 2.0, %v1816_v29 }
 0x341   :  { %v1831_v7 = vsub.f32 2.0, %v1815_v40  ;;  %v1848_v42 = vmul.f32 %v2127_v17, %v1832_v32 }
 0x343   :  { %v1847_v25 = vmul.f32 %v2129_v39, %v1831_v7  ;;  %1865 = vst.msk [vmem:[%s3069_s4 + $0x78] sm:$0xff] %vm1849_vm2, %v1848_v42 }
 0x345   :  { %1864 = vst.msk [vmem:[%s3069_s4 + $0x70] sm:$0xff] %vm1849_vm2, %v1847_v25 }

</bundles_post_ra>
